<compile_context>
chip_gen: v5e
topology: v5e:2x2
jax: 0.10.0
libtpu: 0.0.40
codegen_flags: <defaults>
</compile_context>

<pallas_src>
import functools

import jax
import jax.numpy as jnp
from jax.experimental import pallas as pl
from jax.experimental.pallas import tpu as pltpu


def textcnn_kernel(x_ref, wall_ref, ball_ref, wfc_ref, bfc_ref, out_ref, *,
                   L, K, TB):
    """One grid step = TB batch elements.

    x_ref   : (TB*L, H)   bf16  embedded tokens, (batch, time) flattened on rows
    wall_ref: (5, H, Kp3) bf16  combined per-tap conv weight (zero-padded taps)
    ball_ref: (1, Kp3)    f32   combined conv bias (lane-padded)
    wfc_ref : (Kp3, Cp)   bf16  final linear weight (lane-padded rows/cols)
    bfc_ref : (1, Cp)     f32   final linear bias
    out_ref : (TB, Cp)    f32
    """
    x = x_ref[...]                                        # (R, H) bf16
    R, H = x.shape
    Kp3 = wall_ref.shape[-1]                              # lane-padded 3*K

    # Time position of each row within its batch element, as an (R, 1) column
    # (for power-of-two L the % lowers to an AND).
    pos = jax.lax.broadcasted_iota(jnp.int32, (R, 1), 0) % L

    # Conv taps: tap t reads time position pos + (t - 2); zero outside [0, L)
    # (== Conv1d zero padding).  Each shifted tap is matmul'd and accumulated
    # straight into the f32 conv output -- no im2col concat / (R, 5H) temp.
    acc = None
    for t in range(5):
        s = t - 2
        if s == 0:
            xt = x
        else:
            if s > 0:
                shifted = jnp.concatenate(
                    [x[s:, :], jnp.zeros((s, H), x.dtype)], axis=0)
            else:
                shifted = jnp.concatenate(
                    [jnp.zeros((-s, H), x.dtype), x[:R + s, :]], axis=0)
            # Rows whose source position falls outside [0, L) (batch-element
            # boundary or tile boundary) read zeros, exactly like Conv1d pad.
            valid = (pos + s >= 0) & (pos + s < L)         # (R, 1)
            xt = jnp.where(valid, shifted, jnp.zeros_like(shifted))
        part = jnp.dot(xt, wall_ref[t], preferred_element_type=jnp.float32)
        acc = part if acc is None else acc + part
    y = acc + ball_ref[...]                               # (R, Kp3) f32

    # Column groups: [0,K) sigmoid (conv0), [K,2K) tanh (conv1), [2K,3K) relu
    # (conv2); padded columns [3K,Kp3) fall in the relu branch and stay 0.
    col = jax.lax.broadcasted_iota(jnp.int32, (1, Kp3), 1)
    is_sig = col < K
    is_tanh = (col >= K) & (col < 2 * K)
    # sigmoid(y) = 0.5 * tanh(y / 2) + 0.5  -> one EUP tanh pass over the tile.
    t_all = jnp.tanh(jnp.where(is_sig, 0.5 * y, y))
    act = jnp.where(is_sig, 0.5 * t_all + 0.5,
                    jnp.where(is_tanh, t_all, jnp.maximum(y, 0.0)))

    # conv1 (k=4, pad=1) only has L-1 valid output positions: mask its extra
    # position (time L-1) with -inf so it never wins the max-pool.
    # (Assumes L >= 2; at L == 1 the tanh group would have no valid output.)
    act = jnp.where((pos == L - 1) & is_tanh, -jnp.inf, act)

    # Global max-pool over time.  L is a multiple of 8 here so the reshape is a
    # pure sublane-group view; pad L (and -inf-mask the padding) for other L.
    pooled = jnp.max(act.reshape(TB, L, Kp3), axis=1)     # (TB, Kp3) f32

    # Final linear on the MXU: bf16 x bf16 -> f32, lane-dense (TB, Cp) store.
    out_ref[...] = (jnp.dot(pooled.astype(jnp.bfloat16), wfc_ref[...],
                            preferred_element_type=jnp.float32)
                    + bfc_ref[...])


def _round_up(x, m):
    return ((x + m - 1) // m) * m


def _pack_conv_weights(w0, w1, w2, kp3):
    """Combine conv0/1/2 into one (5, H, Kp3) per-tap weight (zero-padded)."""
    _, H, K = w2.shape
    z = jnp.zeros((1, H, K), w0.dtype)
    w0p = jnp.concatenate([z, w0, z], axis=0)     # k=3, pad=1 -> tap slots 1..3
    w1p = jnp.concatenate([z, w1], axis=0)        # k=4, pad=1 -> tap slots 1..4
    wall = jnp.concatenate([w0p, w1p, w2], axis=2)            # (5, H, 3K)
    return jnp.pad(wall, ((0, 0), (0, 0), (0, kp3 - 3 * K)))  # lane-pad cols


def _vmem_bytes_estimate(TB, L, H, kp3, cp):
    """Rough per-step VMEM footprint (double-buffered blocks + live temps)."""
    R = TB * L
    x_blocks = 2 * R * H * 2                               # bf16 input tile x2
    w_blocks = 2 * (5 * H * kp3 * 2 + kp3 * 4 + kp3 * cp * 2 + cp * 4)
    o_blocks = 2 * TB * cp * 4
    temps = 4 * R * kp3 * 4 + 2 * R * H * 2                # y/act/partials + taps
    return x_blocks + w_blocks + o_blocks + temps


def _choose_tb(B, L, target_rows=512):
    """Batch-tile size: >= target rows per step (amortize ~0.35us/step and fill
    the MXU M-dim), power of two >= 8 (keeps blocks (8,128)-aligned), and kept
    small enough that the grid stays >= 2 where B allows (v7x megacore)."""
    tb = max(8, pl.next_power_of_2(pl.cdiv(target_rows, L)))
    half = pl.cdiv(B, 2)
    while tb > 16 and tb > half:
        tb //= 2
    return tb


def textcnn_forward(token_ids, attention_mask, params, *, tb=None):
    """Eval-mode forward matching TextCNN.forward (dropout = identity)."""
    del attention_mask                      # unused by the PyTorch forward too
    B, L = token_ids.shape
    H = params["embed"].shape[1]
    K = params["w0"].shape[-1]
    C = params["wfc"].shape[-1]
    Kp3 = _round_up(3 * K, 128)             # lane-dense conv-output dim
    Cp = _round_up(C, 128)                  # lane-dense FC-output dim

    TB = _choose_tb(B, L) if tb is None else tb
    # Keep the per-step working set inside a v7x-safe VMEM budget (64 MiB phys,
    # 48 MiB target); v5e/v6e (128 MiB) could go larger but this is plenty.
    budget = 48 * 2**20
    while TB > 16 and _vmem_bytes_estimate(TB, L, H, Kp3, Cp) > budget:
        TB //= 2
    B_pad = _round_up(B, TB)
    ids = jnp.pad(token_ids, ((0, B_pad - B), (0, 0)))     # pad ids, not activations

    # Embedding gather stays as plain-JAX glue; cast the table to bf16 first so
    # the gathered (B_pad*L, H) slab is written/read once at half width.
    # TODO(synk): fuse the gather in-kernel once a batched/vectorized gather is
    # available (per-row DMA descriptors cost more than this slab round trip).
    emb = params["embed"].astype(jnp.bfloat16)
    x2 = jnp.take(emb, ids.reshape(-1), axis=0)            # (B_pad*L, H) bf16

    wall = _pack_conv_weights(params["w0"], params["w1"], params["w2"],
                              Kp3).astype(jnp.bfloat16)               # (5,H,Kp3)
    ball = jnp.zeros((1, Kp3), jnp.float32).at[:, :3 * K].set(
        jnp.concatenate([params["b0"], params["b1"], params["b2"]], axis=-1))
    # Padded wfc rows/cols stay exactly zero so padded pooled columns (and the
    # padded logits) contribute nothing.
    wfc = jnp.zeros((Kp3, Cp), jnp.float32).at[:3 * K, :C].set(
        params["wfc"]).astype(jnp.bfloat16)
    bfc = jnp.zeros((1, Cp), jnp.float32).at[:, :C].set(params["bfc"])

    vmem_limit = int(min(budget, max(32 * 2**20,
                                     2 * _vmem_bytes_estimate(TB, L, H, Kp3, Cp))))

    kernel = functools.partial(textcnn_kernel, L=L, K=K, TB=TB)
    out = pl.pallas_call(
        kernel,
        out_shape=jax.ShapeDtypeStruct((B_pad, Cp), jnp.float32),
        grid=(B_pad // TB,),
        in_specs=[
            pl.BlockSpec((TB * L, H), lambda b: (b, 0)),
            pl.BlockSpec((5, H, Kp3), lambda b: (0, 0, 0)),
            pl.BlockSpec((1, Kp3), lambda b: (0, 0)),
            pl.BlockSpec((Kp3, Cp), lambda b: (0, 0)),
            pl.BlockSpec((1, Cp), lambda b: (0, 0)),
        ],
        out_specs=pl.BlockSpec((TB, Cp), lambda b: (b, 0)),
        compiler_params=pltpu.CompilerParams(
            dimension_semantics=("parallel",),
            vmem_limit_bytes=vmem_limit),
    )(x2, wall, ball, wfc, bfc)
    return out[:B, :C]


def reference_forward(token_ids, params):
    """Pure-JAX f32 reference with identical math (correctness check)."""
    emb = jnp.take(params["embed"], token_ids, axis=0)     # (B, L, H)
    B, L, H = emb.shape
    xp = jnp.pad(emb, ((0, 0), (2, 2), (0, 0)))

    def conv(w, b, ksize, start, l_out):
        acc = jnp.zeros((B, l_out, w.shape[-1]), jnp.float32)
        for t in range(ksize):
            acc = acc + jnp.einsum(
                "blh,hk->blk", xp[:, start + t:start + t + l_out, :], w[t])
        return acc + b

    a0 = jax.nn.sigmoid(conv(params["w0"], params["b0"], 3, 1, L))
    a1 = jnp.tanh(conv(params["w1"], params["b1"], 4, 1, L - 1))
    a2 = jnp.maximum(conv(params["w2"], params["b2"], 5, 0, L), 0.0)
    feat = jnp.concatenate(
        [jnp.max(a0, axis=1), jnp.max(a1, axis=1), jnp.max(a2, axis=1)], axis=1)
    return feat @ params["wfc"] + params["bfc"]


def init_params(key, vocab_size, hidden_dim, ker_num, num_class):
    keys = jax.random.split(key, 9)

    def norm(k, shape, scale=0.1):
        return scale * jax.random.normal(k, shape, jnp.float32)

    return dict(
        embed=norm(keys[0], (vocab_size, hidden_dim)),
        w0=norm(keys[1], (3, hidden_dim, ker_num)),    # conv0 weight (taps, H, K)
        b0=norm(keys[2], (1, ker_num)),
        w1=norm(keys[3], (4, hidden_dim, ker_num)),    # conv1 weight
        b1=norm(keys[4], (1, ker_num)),
        w2=norm(keys[5], (5, hidden_dim, ker_num)),    # conv2 weight
        b2=norm(keys[6], (1, ker_num)),
        wfc=norm(keys[7], (3 * ker_num, num_class)),   # Linear(ker_num*3, num_class)
        bfc=norm(keys[8], (1, num_class)),
    )


if __name__ == "__main__":
    # Small deterministic config: hidden_dim=32, seq_len=8, ker_num=16,
    # num_class=4, vocab_size=128.  B=30 exercises batch-tile padding; the TB
    # heuristic picks TB=16 -> grid=2 (both v7x TensorCores busy), M=TB*L=128.
    B, L, H, K, C, V = 30, 8, 32, 16, 4, 128

    key = jax.random.PRNGKey(0)
    pkey, xkey = jax.random.split(key)
    params = init_params(pkey, V, H, K, C)

    token_ids = jax.random.randint(xkey, (B, L), 0, V, dtype=jnp.int32)
    attention_mask = jnp.ones((B, L), dtype=jnp.int32)  # unused (PyTorch parity)

    out = jax.block_until_ready(textcnn_forward(token_ids, attention_mask, params))
    ref = reference_forward(token_ids, params)

    assert out.shape == (B, C), out.shape
    err = float(jnp.max(jnp.abs(out - ref)))
    # bf16 conv + bf16 FC on the MXU vs the all-f32 reference.
    assert err < 2e-2, f"max abs err {err}"

    print("KERNEL_OK")
</pallas_src>

<mosaic_0001>
module attributes {stable_mosaic.version = 11 : i64} {
  func.func @textcnn_kernel(%arg0: i32, %arg1: memref<128x32xbf16, #tpu.memory_space<vmem>>, %arg2: memref<5x32x128xbf16, #tpu.memory_space<vmem>>, %arg3: memref<1x128xf32, #tpu.memory_space<vmem>>, %arg4: memref<128x128xbf16, #tpu.memory_space<vmem>>, %arg5: memref<1x128xf32, #tpu.memory_space<vmem>>, %arg6: memref<16x128xf32, #tpu.memory_space<vmem>>) attributes {dimension_semantics = [#tpu.dimension_semantics<parallel>], iteration_bounds = array<i64: 2>, scalar_prefetch = 0 : i64, scratch_operands = 0 : i64, tpu.core_type = #tpu.core_type<tc>, window_params = [{transform_indices = @transform_0, window_bounds = array<i64: 128, 32>}, {pipeline_mode = #tpu.pipeline_mode<synchronous>, transform_indices = @transform_1, window_bounds = array<i64: 5, 32, 128>}, {pipeline_mode = #tpu.pipeline_mode<synchronous>, transform_indices = @transform_2, window_bounds = array<i64: 1, 128>}, {pipeline_mode = #tpu.pipeline_mode<synchronous>, transform_indices = @transform_3, window_bounds = array<i64: 128, 128>}, {pipeline_mode = #tpu.pipeline_mode<synchronous>, transform_indices = @transform_4, window_bounds = array<i64: 1, 128>}, {transform_indices = @transform_5, window_bounds = array<i64: 16, 128>}]} {
    %c0 = arith.constant 0 : index
    %c0_0 = arith.constant 0 : index
    %0 = vector.load %arg1[%c0, %c0_0] : memref<128x32xbf16, #tpu.memory_space<vmem>>, vector<128x32xbf16>
    %1 = tpu.iota {dimensions = array<i32: 0>} : vector<128x1xi32>
    %c8_i32 = arith.constant 8 : i32
    %c0_i32 = arith.constant 0 : i32
    %2 = arith.cmpi eq, %c8_i32, %c0_i32 : i32
    %c1_i32 = arith.constant 1 : i32
    %3 = arith.select %2, %c1_i32, %c8_i32 : i32
    %4 = vector.broadcast %3 : i32 to vector<128x1xi32>
    %5 = arith.remsi %1, %4 : vector<128x1xi32>
    %c0_i32_1 = arith.constant 0 : i32
    %6 = vector.broadcast %c0_i32_1 : i32 to vector<128x1xi32>
    %7 = arith.cmpi ne, %5, %6 : vector<128x1xi32>
    %c0_i32_2 = arith.constant 0 : i32
    %8 = vector.broadcast %c0_i32_2 : i32 to vector<128x1xi32>
    %9 = arith.cmpi slt, %5, %8 : vector<128x1xi32>
    %c0_i32_3 = arith.constant 0 : i32
    %10 = arith.cmpi slt, %3, %c0_i32_3 : i32
    %11 = vector.broadcast %10 : i1 to vector<128x1xi1>
    %12 = vector.broadcast %11 : vector<128x1xi1> to vector<128x1xi1>
    %13 = arith.xori %9, %12 : vector<128x1xi1>
    %14 = arith.andi %13, %7 : vector<128x1xi1>
    %15 = vector.broadcast %3 : i32 to vector<128x1xi32>
    %16 = arith.addi %5, %15 : vector<128x1xi32>
    %17 = arith.select %14, %16, %5 : vector<128x1xi1>, vector<128x1xi32>
    %cst = arith.constant 0.000000e+00 : bf16
    %18 = vector.broadcast %cst : bf16 to vector<2x32xbf16>
    %19 = vector.extract_strided_slice %0 {offsets = [0, 0], sizes = [126, 32], strides = [1, 1]} : vector<128x32xbf16> to vector<126x32xbf16>
    %20 = tpu.concatenate %18, %19 in 0 : vector<2x32xbf16>, vector<126x32xbf16> -> vector<128x32xbf16>
    %c-2_i32 = arith.constant -2 : i32
    %21 = vector.broadcast %c-2_i32 : i32 to vector<128x1xi32>
    %22 = arith.addi %17, %21 : vector<128x1xi32>
    %c0_i32_4 = arith.constant 0 : i32
    %23 = vector.broadcast %c0_i32_4 : i32 to vector<128x1xi32>
    %24 = arith.cmpi sge, %22, %23 : vector<128x1xi32>
    %c-2_i32_5 = arith.constant -2 : i32
    %25 = vector.broadcast %c-2_i32_5 : i32 to vector<128x1xi32>
    %26 = arith.addi %17, %25 : vector<128x1xi32>
    %c8_i32_6 = arith.constant 8 : i32
    %27 = vector.broadcast %c8_i32_6 : i32 to vector<128x1xi32>
    %28 = arith.cmpi slt, %26, %27 : vector<128x1xi32>
    %29 = arith.andi %24, %28 : vector<128x1xi1>
    %cst_7 = arith.constant 0.000000e+00 : bf16
    %30 = vector.broadcast %cst_7 : bf16 to vector<128x32xbf16>
    %31 = vector.shape_cast %29 : vector<128x1xi1> to vector<128x1xi1>
    %32 = vector.broadcast %31 : vector<128x1xi1> to vector<128x32xi1>
    %33 = arith.select %32, %20, %30 : vector<128x32xi1>, vector<128x32xbf16>
    %c0_8 = arith.constant 0 : index
    %c0_9 = arith.constant 0 : index
    %c0_10 = arith.constant 0 : index
    %34 = vector.load %arg2[%c0_8, %c0_9, %c0_10] : memref<5x32x128xbf16, #tpu.memory_space<vmem>>, vector<1x32x128xbf16>
    %35 = vector.shape_cast %34 : vector<1x32x128xbf16> to vector<32x128xbf16>
    %cst_11 = arith.constant dense<0.000000e+00> : vector<128x128xf32>
    %36 = tpu.matmul %33, %35, %cst_11 {dimension_numbers = #tpu.dot_dimension_numbers<[1], [0], [0], [1], [0, 0, 1, 1], [], []>} : vector<128x32xbf16>, vector<32x128xbf16>, vector<128x128xf32> -> vector<128x128xf32>
    %cst_12 = arith.constant 0.000000e+00 : bf16
    %37 = vector.broadcast %cst_12 : bf16 to vector<1x32xbf16>
    %38 = vector.extract_strided_slice %0 {offsets = [0, 0], sizes = [127, 32], strides = [1, 1]} : vector<128x32xbf16> to vector<127x32xbf16>
    %39 = tpu.concatenate %37, %38 in 0 : vector<1x32xbf16>, vector<127x32xbf16> -> vector<128x32xbf16>
    %c-1_i32 = arith.constant -1 : i32
    %40 = vector.broadcast %c-1_i32 : i32 to vector<128x1xi32>
    %41 = arith.addi %17, %40 : vector<128x1xi32>
    %c0_i32_13 = arith.constant 0 : i32
    %42 = vector.broadcast %c0_i32_13 : i32 to vector<128x1xi32>
    %43 = arith.cmpi sge, %41, %42 : vector<128x1xi32>
    %c-1_i32_14 = arith.constant -1 : i32
    %44 = vector.broadcast %c-1_i32_14 : i32 to vector<128x1xi32>
    %45 = arith.addi %17, %44 : vector<128x1xi32>
    %c8_i32_15 = arith.constant 8 : i32
    %46 = vector.broadcast %c8_i32_15 : i32 to vector<128x1xi32>
    %47 = arith.cmpi slt, %45, %46 : vector<128x1xi32>
    %48 = arith.andi %43, %47 : vector<128x1xi1>
    %cst_16 = arith.constant 0.000000e+00 : bf16
    %49 = vector.broadcast %cst_16 : bf16 to vector<128x32xbf16>
    %50 = vector.shape_cast %48 : vector<128x1xi1> to vector<128x1xi1>
    %51 = vector.broadcast %50 : vector<128x1xi1> to vector<128x32xi1>
    %52 = arith.select %51, %39, %49 : vector<128x32xi1>, vector<128x32xbf16>
    %c1 = arith.constant 1 : index
    %c0_17 = arith.constant 0 : index
    %c0_18 = arith.constant 0 : index
    %53 = vector.load %arg2[%c1, %c0_17, %c0_18] : memref<5x32x128xbf16, #tpu.memory_space<vmem>>, vector<1x32x128xbf16>
    %54 = vector.shape_cast %53 : vector<1x32x128xbf16> to vector<32x128xbf16>
    %cst_19 = arith.constant dense<0.000000e+00> : vector<128x128xf32>
    %55 = tpu.matmul %52, %54, %cst_19 {dimension_numbers = #tpu.dot_dimension_numbers<[1], [0], [0], [1], [0, 0, 1, 1], [], []>} : vector<128x32xbf16>, vector<32x128xbf16>, vector<128x128xf32> -> vector<128x128xf32>
    %56 = arith.addf %36, %55 : vector<128x128xf32>
    %c2 = arith.constant 2 : index
    %c0_20 = arith.constant 0 : index
    %c0_21 = arith.constant 0 : index
    %57 = vector.load %arg2[%c2, %c0_20, %c0_21] : memref<5x32x128xbf16, #tpu.memory_space<vmem>>, vector<1x32x128xbf16>
    %58 = vector.shape_cast %57 : vector<1x32x128xbf16> to vector<32x128xbf16>
    %cst_22 = arith.constant dense<0.000000e+00> : vector<128x128xf32>
    %59 = tpu.matmul %0, %58, %cst_22 {dimension_numbers = #tpu.dot_dimension_numbers<[1], [0], [0], [1], [0, 0, 1, 1], [], []>} : vector<128x32xbf16>, vector<32x128xbf16>, vector<128x128xf32> -> vector<128x128xf32>
    %60 = arith.addf %56, %59 : vector<128x128xf32>
    %61 = vector.extract_strided_slice %0 {offsets = [1, 0], sizes = [127, 32], strides = [1, 1]} : vector<128x32xbf16> to vector<127x32xbf16>
    %cst_23 = arith.constant 0.000000e+00 : bf16
    %62 = vector.broadcast %cst_23 : bf16 to vector<1x32xbf16>
    %63 = tpu.concatenate %61, %62 in 0 : vector<127x32xbf16>, vector<1x32xbf16> -> vector<128x32xbf16>
    %c1_i32_24 = arith.constant 1 : i32
    %64 = vector.broadcast %c1_i32_24 : i32 to vector<128x1xi32>
    %65 = arith.addi %17, %64 : vector<128x1xi32>
    %c0_i32_25 = arith.constant 0 : i32
    %66 = vector.broadcast %c0_i32_25 : i32 to vector<128x1xi32>
    %67 = arith.cmpi sge, %65, %66 : vector<128x1xi32>
    %c1_i32_26 = arith.constant 1 : i32
    %68 = vector.broadcast %c1_i32_26 : i32 to vector<128x1xi32>
    %69 = arith.addi %17, %68 : vector<128x1xi32>
    %c8_i32_27 = arith.constant 8 : i32
    %70 = vector.broadcast %c8_i32_27 : i32 to vector<128x1xi32>
    %71 = arith.cmpi slt, %69, %70 : vector<128x1xi32>
    %72 = arith.andi %67, %71 : vector<128x1xi1>
    %cst_28 = arith.constant 0.000000e+00 : bf16
    %73 = vector.broadcast %cst_28 : bf16 to vector<128x32xbf16>
    %74 = vector.shape_cast %72 : vector<128x1xi1> to vector<128x1xi1>
    %75 = vector.broadcast %74 : vector<128x1xi1> to vector<128x32xi1>
    %76 = arith.select %75, %63, %73 : vector<128x32xi1>, vector<128x32xbf16>
    %c3 = arith.constant 3 : index
    %c0_29 = arith.constant 0 : index
    %c0_30 = arith.constant 0 : index
    %77 = vector.load %arg2[%c3, %c0_29, %c0_30] : memref<5x32x128xbf16, #tpu.memory_space<vmem>>, vector<1x32x128xbf16>
    %78 = vector.shape_cast %77 : vector<1x32x128xbf16> to vector<32x128xbf16>
    %cst_31 = arith.constant dense<0.000000e+00> : vector<128x128xf32>
    %79 = tpu.matmul %76, %78, %cst_31 {dimension_numbers = #tpu.dot_dimension_numbers<[1], [0], [0], [1], [0, 0, 1, 1], [], []>} : vector<128x32xbf16>, vector<32x128xbf16>, vector<128x128xf32> -> vector<128x128xf32>
    %80 = arith.addf %60, %79 : vector<128x128xf32>
    %81 = vector.extract_strided_slice %0 {offsets = [2, 0], sizes = [126, 32], strides = [1, 1]} : vector<128x32xbf16> to vector<126x32xbf16>
    %cst_32 = arith.constant 0.000000e+00 : bf16
    %82 = vector.broadcast %cst_32 : bf16 to vector<2x32xbf16>
    %83 = tpu.concatenate %81, %82 in 0 : vector<126x32xbf16>, vector<2x32xbf16> -> vector<128x32xbf16>
    %c2_i32 = arith.constant 2 : i32
    %84 = vector.broadcast %c2_i32 : i32 to vector<128x1xi32>
    %85 = arith.addi %17, %84 : vector<128x1xi32>
    %c0_i32_33 = arith.constant 0 : i32
    %86 = vector.broadcast %c0_i32_33 : i32 to vector<128x1xi32>
    %87 = arith.cmpi sge, %85, %86 : vector<128x1xi32>
    %c2_i32_34 = arith.constant 2 : i32
    %88 = vector.broadcast %c2_i32_34 : i32 to vector<128x1xi32>
    %89 = arith.addi %17, %88 : vector<128x1xi32>
    %c8_i32_35 = arith.constant 8 : i32
    %90 = vector.broadcast %c8_i32_35 : i32 to vector<128x1xi32>
    %91 = arith.cmpi slt, %89, %90 : vector<128x1xi32>
    %92 = arith.andi %87, %91 : vector<128x1xi1>
    %cst_36 = arith.constant 0.000000e+00 : bf16
    %93 = vector.broadcast %cst_36 : bf16 to vector<128x32xbf16>
    %94 = vector.shape_cast %92 : vector<128x1xi1> to vector<128x1xi1>
    %95 = vector.broadcast %94 : vector<128x1xi1> to vector<128x32xi1>
    %96 = arith.select %95, %83, %93 : vector<128x32xi1>, vector<128x32xbf16>
    %c4 = arith.constant 4 : index
    %c0_37 = arith.constant 0 : index
    %c0_38 = arith.constant 0 : index
    %97 = vector.load %arg2[%c4, %c0_37, %c0_38] : memref<5x32x128xbf16, #tpu.memory_space<vmem>>, vector<1x32x128xbf16>
    %98 = vector.shape_cast %97 : vector<1x32x128xbf16> to vector<32x128xbf16>
    %cst_39 = arith.constant dense<0.000000e+00> : vector<128x128xf32>
    %99 = tpu.matmul %96, %98, %cst_39 {dimension_numbers = #tpu.dot_dimension_numbers<[1], [0], [0], [1], [0, 0, 1, 1], [], []>} : vector<128x32xbf16>, vector<32x128xbf16>, vector<128x128xf32> -> vector<128x128xf32>
    %100 = arith.addf %80, %99 : vector<128x128xf32>
    %c0_40 = arith.constant 0 : index
    %c0_41 = arith.constant 0 : index
    %101 = vector.load %arg3[%c0_40, %c0_41] : memref<1x128xf32, #tpu.memory_space<vmem>>, vector<1x128xf32>
    %102 = vector.broadcast %101 : vector<1x128xf32> to vector<128x128xf32>
    %103 = arith.addf %100, %102 : vector<128x128xf32>
    %104 = tpu.iota {dimensions = array<i32: 1>} : vector<1x128xi32>
    %c16_i32 = arith.constant 16 : i32
    %105 = vector.broadcast %c16_i32 : i32 to vector<1x128xi32>
    %106 = arith.cmpi slt, %104, %105 : vector<1x128xi32>
    %c16_i32_42 = arith.constant 16 : i32
    %107 = vector.broadcast %c16_i32_42 : i32 to vector<1x128xi32>
    %108 = arith.cmpi sge, %104, %107 : vector<1x128xi32>
    %c32_i32 = arith.constant 32 : i32
    %109 = vector.broadcast %c32_i32 : i32 to vector<1x128xi32>
    %110 = arith.cmpi slt, %104, %109 : vector<1x128xi32>
    %111 = arith.andi %108, %110 : vector<1x128xi1>
    %cst_43 = arith.constant 5.000000e-01 : f32
    %112 = vector.broadcast %cst_43 : f32 to vector<128x128xf32>
    %113 = arith.mulf %112, %103 : vector<128x128xf32>
    %114 = vector.shape_cast %106 : vector<1x128xi1> to vector<1x128xi1>
    %115 = vector.broadcast %114 : vector<1x128xi1> to vector<128x128xi1>
    %116 = arith.select %115, %113, %103 : vector<128x128xi1>, vector<128x128xf32>
    %117 = math.tanh %116 : vector<128x128xf32>
    %cst_44 = arith.constant 5.000000e-01 : f32
    %118 = vector.broadcast %cst_44 : f32 to vector<128x128xf32>
    %119 = arith.mulf %118, %117 : vector<128x128xf32>
    %cst_45 = arith.constant 5.000000e-01 : f32
    %120 = vector.broadcast %cst_45 : f32 to vector<128x128xf32>
    %121 = arith.addf %119, %120 : vector<128x128xf32>
    %cst_46 = arith.constant 0.000000e+00 : f32
    %122 = vector.broadcast %cst_46 : f32 to vector<128x128xf32>
    %123 = arith.maximumf %103, %122 : vector<128x128xf32>
    %124 = vector.shape_cast %111 : vector<1x128xi1> to vector<1x128xi1>
    %125 = vector.broadcast %124 : vector<1x128xi1> to vector<128x128xi1>
    %126 = arith.select %125, %117, %123 : vector<128x128xi1>, vector<128x128xf32>
    %127 = vector.shape_cast %106 : vector<1x128xi1> to vector<1x128xi1>
    %128 = vector.broadcast %127 : vector<1x128xi1> to vector<128x128xi1>
    %129 = arith.select %128, %121, %126 : vector<128x128xi1>, vector<128x128xf32>
    %c7_i32 = arith.constant 7 : i32
    %130 = vector.broadcast %c7_i32 : i32 to vector<128x1xi32>
    %131 = arith.cmpi eq, %17, %130 : vector<128x1xi32>
    %132 = vector.broadcast %131 : vector<128x1xi1> to vector<128x128xi1>
    %133 = vector.broadcast %111 : vector<1x128xi1> to vector<128x128xi1>
    %134 = arith.andi %132, %133 : vector<128x128xi1>
    %cst_47 = arith.constant 0xFF800000 : f32
    %135 = vector.broadcast %cst_47 : f32 to vector<128x128xf32>
    %136 = arith.select %134, %135, %129 : vector<128x128xi1>, vector<128x128xf32>
    %137 = vector.shape_cast %136 : vector<128x128xf32> to vector<16x8x128xf32>
    %cst_48 = arith.constant dense<0xFF800000> : vector<16x128xf32>
    %138 = vector.multi_reduction <maximumf>, %137, %cst_48 [1] : vector<16x8x128xf32> to vector<16x128xf32>
    %139 = arith.truncf %138 : vector<16x128xf32> to vector<16x128xbf16>
    %c0_49 = arith.constant 0 : index
    %c0_50 = arith.constant 0 : index
    %140 = vector.load %arg4[%c0_49, %c0_50] : memref<128x128xbf16, #tpu.memory_space<vmem>>, vector<128x128xbf16>
    %cst_51 = arith.constant dense<0.000000e+00> : vector<16x128xf32>
    %141 = tpu.matmul %139, %140, %cst_51 {dimension_numbers = #tpu.dot_dimension_numbers<[1], [0], [0], [1], [0, 0, 1, 1], [], []>} : vector<16x128xbf16>, vector<128x128xbf16>, vector<16x128xf32> -> vector<16x128xf32>
    %c0_52 = arith.constant 0 : index
    %c0_53 = arith.constant 0 : index
    %142 = vector.load %arg5[%c0_52, %c0_53] : memref<1x128xf32, #tpu.memory_space<vmem>>, vector<1x128xf32>
    %143 = vector.broadcast %142 : vector<1x128xf32> to vector<16x128xf32>
    %144 = arith.addf %141, %143 : vector<16x128xf32>
    %c0_54 = arith.constant 0 : index
    %c0_55 = arith.constant 0 : index
    %145 = vector.load %arg6[%c0_54, %c0_55] : memref<16x128xf32, #tpu.memory_space<vmem>>, vector<16x128xf32>
    tpu.vector_store %arg6[%c0_54, %c0_55], %144 {strides = array<i32>} : memref<16x128xf32, #tpu.memory_space<vmem>>, vector<16x128xf32>,
    return
  }
  func.func @transform_0(%arg0: i32) -> (i32, i32) {
    %c0_i32 = arith.constant 0 : i32
    %c0_i32_0 = arith.constant 0 : i32
    return %arg0, %c0_i32 : i32, i32
  }
  func.func @transform_1(%arg0: i32) -> (i32, i32, i32) {
    %c0_i32 = arith.constant 0 : i32
    %c0_i32_0 = arith.constant 0 : i32
    %c0_i32_1 = arith.constant 0 : i32
    %c0_i32_2 = arith.constant 0 : i32
    return %c0_i32, %c0_i32_0, %c0_i32_1 : i32, i32, i32
  }
  func.func @transform_2(%arg0: i32) -> (i32, i32) {
    %c0_i32 = arith.constant 0 : i32
    %c0_i32_0 = arith.constant 0 : i32
    %c0_i32_1 = arith.constant 0 : i32
    return %c0_i32, %c0_i32_0 : i32, i32
  }
  func.func @transform_3(%arg0: i32) -> (i32, i32) {
    %c0_i32 = arith.constant 0 : i32
    %c0_i32_0 = arith.constant 0 : i32
    %c0_i32_1 = arith.constant 0 : i32
    return %c0_i32, %c0_i32_0 : i32, i32
  }
  func.func @transform_4(%arg0: i32) -> (i32, i32) {
    %c0_i32 = arith.constant 0 : i32
    %c0_i32_0 = arith.constant 0 : i32
    %c0_i32_1 = arith.constant 0 : i32
    return %c0_i32, %c0_i32_0 : i32, i32
  }
  func.func @transform_5(%arg0: i32) -> (i32, i32) {
    %c0_i32 = arith.constant 0 : i32
    %c0_i32_0 = arith.constant 0 : i32
    return %arg0, %c0_i32 : i32, i32
  }
}

</mosaic_0001>

<bundles_post_ra>
// kernel: tpu_custom_call.1
= control target key start
LH: loop header
LB: loop body
LE: loop exit
PB: predicated region body
PF: predicated region fallthrough
CT: control target
= control target key end

     0   :  { %10 = vsyncpa [#allocation3], 0  ;;  %s4073_s0 = inlined_call_operand.vmem [shape: bf16[256,32], index: 0, kind: input, shape index: {}]   ;;  %s4074_s1 = inlined_call_operand.vmem [shape: bf16[5,32,128], index: 1, kind: input, shape index: {}]   ;;  %s4075_s2 = inlined_call_operand.vmem [shape: f32[1,128], index: 2, kind: input, shape index: {}]   ;;  %s4076_s3 = inlined_call_operand.vmem [shape: bf16[128,128], index: 3, kind: input, shape index: {}]   ;;  %s4077_s4 = inlined_call_operand.vmem [shape: f32[1,128], index: 4, kind: input, shape index: {}]   ;;  %s4078_s5 = inlined_call_operand.hbm [shape: f32[32,128], index: 5, kind: output, shape index: {}]  }
   0x1   :  { %12 = vsyncpa [#allocation3 + $0x1], 0  ;;  %s3024_s18 = smov 0   ;;  %s3026_s19 = smov 0  }
   0x2   :  { %s3028_s20 = smov 0   ;;  %s3030_s21 = smov 0  }
   0x3 LB: > { %s2578_s22 = sadd.s32 4294967295, %s2989_s21   ;;  %s2579_s23 = sadd.s32 4294967294, %s2989_s21   ;;  %s2989_s21 = sphi %s3030_s21, %s4120_s21   ;;  %s2985_s20 = sphi %s3028_s20, %s4119_s20   ;;  %s2981_s19 = sphi %s3026_s19, %s4118_s19   ;;  %s2977_s18 = sphi %s3024_s18, %s4117_s18  }
   0x4   : > { %s3047_s24 = sadd.s32 1, %s2989_s21   ;;  %s135_s25 = sadd.s32 1, %s2985_s20 }
   0x5   : > { %s132_s26 = ssub.s32 %s2989_s21, %s3047_s24  ;;  %p145_p0 = scmp.ne.s32.totalorder %s2985_s20, %s2981_s19 }
   0x6   : > { %p133_p1 = scmp.eq.s32.totalorder %s132_s26, 0  ;;  %p146_p2 = scmp.eq.s32.totalorder %s2578_s22, 1 }
   0x7   : > { %p151_p3 = scmp.ne.s32.totalorder %s2981_s19, %s2977_s18  ;;  %p152_p4 = scmp.eq.s32.totalorder %s2579_s23, 1 }
   0x8   : > { %s3057_s27 = scalar_select %p133_p1, %s2985_s20, %s135_s25  }
   0x9   : > { %p3059_p5 = por %p146_p2, %p145_p0  ;;  %p3063_p6 = por %p152_p4, %p151_p3 }
   0xa   : > { %p2582_p7 = scmp.ge.s32.totalorder %s2989_s21, 1  ;;  %p191_p8 = scmp.lt.s32.totalorder %s2989_s21, 3 }
   0xc   : > { %p192_p9 = pnand %p2582_p7, %p191_p8 }
   0xd   : > { %s3075_s9 = sshll.u32 (!%p192_p9), %s2578_s22, 4  ;;  %s216_s17 = sand.u32 (!%p192_p9), 1, %s2981_s19  }
   0xe   : > { %195 = sbr.rel (%p192_p9) target bundleno = 527 (0x20f), region = 40  ;;  %p220_p10 = scmp.lt.s32.totalorder (!%p192_p9), %s3075_s9, 31 }
   0xf   : > { %s2583_s22 = sshll.u32 (!%p192_p9), %s216_s17, 4  ;;  %s2513_s7 = scalar_lea.hbm (!%p192_p9), %s4078_s5, %s3075_s9 }
  0x10   : > { %s218_s26 = scalar_lea.vmem (!%p192_p9), [#allocation2], %s2583_s22  ;;  %s2516_s10 = sshll.u32 (!%p192_p9), %s2513_s7, 4  ;;  %s2517_s10 = int_to_ptr.hbm [resolvable:$true] %s2516_s10 }
  0x11   : > { %s2514_s8 = sshll.u32 (!%p192_p9), %s218_s26, 4  ;;  %s2502_s11 = scalar_lea.sflag (!%p192_p9), [#allocation3], %s216_s17  ;;  %s2515_s8 = int_to_ptr.vmem [resolvable:$true] %s2514_s8 }
  0x12   : > { %s2941_s12 = sshra.s32 (!%p192_p9), %s2517_s10, 4  ;;  %s2947_s16 = scalar_lea.hbm (!%p192_p9), %s4078_s5, 32  ;;  %s2942_s12 = int_to_ptr.hbm [resolvable:$true] %s2941_s12 }
  0x13   : > { %v2826_v0 = vld [vmem:[%s4074_s1 + $0x18] sm:$0xff]  ;;  %v2824_v1 = vld [vmem:[%s4074_s1 + $0x8] sm:$0xff]  ;;  %v245_v2 = vlaneseq  ;;  %v2825_v3 = vld [vmem:[%s4074_s1 + $0x10] sm:$0xff]  ;;  %s221_s14 = scalar_select %p220_p10, %s3075_s9, 31  ;;  %v2991_v9 = vmov 0   ;;  %vm494_vm1 = vcmask 1040384  }
  0x14   : > { %2842 = vmatpush.bf16.msra.mxu2 %v2826_v0  ;;  %1165 = vmatpush.bf16.msra.mxu1 %v2824_v1  ;;  %v2823_v4 = vld [vmem:[%s4074_s1] sm:$0xff]  ;;  %v2828_v6 = vld [vmem:[%s4074_s1 + $0x28] sm:$0xff]  ;;  %v3094_v10 = vunpack.c.l.b16 %v2991_v9  ;;  %vm742_vm0 = vsmask.f32 256  ;;  %v3121_v20 = vunpack.c.h.b16 %v2991_v9  ;;  %vm1049_vm4 = vcmask 261120   ;;  %v2830_v53 = vld [vmem:[%s4074_s1 + $0x38] sm:$0xff]  ;;  %p2948_p0 = scmp.lt.s32.totalorder %s2942_s12, %s4078_s5 }
  0x15   : > { %v3085_v5 = vshrl.u32 %v245_v2, 7  ;;  %1080 = vmatpush.bf16.msra.mxu0 %v2826_v0  ;;  %2843 = vmatpush.bf16.msra.mxu3 %v2826_v0  ;;  %v2832_v11 = vld [vmem:[%s4074_s1 + $0x48] sm:$0xff]  ;;  %s2585_s23 = sshll.u32 %s221_s14, 2  ;;  %vm3145_vm6 = vmand %vm494_vm1, %vm742_vm0  ;;  %v2827_v54 = vld [vmem:[%s4074_s1 + $0x20] sm:$0xff]  ;;  %s2943_s13 = scalar_lea.hbm %s2942_s12, 16 }
  0x16   : > { %s3107_s30 = scalar_lea.vmem %s4073_s0, %s2585_s23  ;;  %p2944_p11 = scmp.ne.s32.totalorder %s2942_s12, %s2943_s13 }
  0x17   : > { %v252_v7 = vadd.s32 48, %v3085_v5  ;;  %v253_v8 = vadd.s32 56, %v3085_v5  ;;  %v247_v12 = vadd.s32 8, %v3085_v5  ;;  %v3101_v13 = vand.u32 7, %v3085_v5  ;;  %v3115_v18 = vld [vmem:[%s3107_s30 + $0x10] sm:$0xff]  ;;  %v3118_v19 = vld [vmem:[%s3107_s30 + $0x18] sm:$0xff]  ;;  %p2949_p1 = scmp.lt.s32.totalorder %s2947_s16, %s2943_s13 }
  0x18   : > { %v258_v14 = vadd.s32 96, %v3085_v5  ;;  %2844 = vmatpush.bf16.msra.mxu2 %v2825_v3  ;;  %1166 = vmatpush.bf16.msra.mxu1 %v2823_v4  ;;  %v259_v17 = vadd.s32 104, %v3085_v5  ;;  %v3124_v21 = vld [vmem:[%s3107_s30] sm:$0xff]  ;;  %v3130_v24 = vadd.s32 64, %v3085_v5  ;;  %v759_v29 = vshrl.u32 %v3115_v18, 16  ;;  %v3172_v48 = vld [vmem:[%s3107_s30 + $0x28] sm:$0xff]  ;;  %p2945_p12 = pnand %p2944_p11, %p3059_p5 }
  0x19   : > { %v3109_v15 = vand.u32 7, %v252_v7  ;;  %v3111_v16 = vand.u32 7, %v253_v8  ;;  %1081 = vmatpush.bf16.msra.mxu0 %v2825_v3  ;;  %v3126_v22 = vand.u32 7, %v247_v12  ;;  %v522_v23 = vadd.s32 4294967294, %v3101_v13  ;;  %2845 = vmatpush.bf16.msra.mxu3 %v2825_v3  ;;  %v3188_v59 = vld [vmem:[%s3107_s30 + $0x30] sm:$0xff]  ;;  %v3201_v7 = vld [vmem:[%s3107_s30 + $0x20] sm:$0xff]  ;;  %p2950_p2 = por %p2949_p1, %p2948_p0 }
  0x1a   : > { %v816_v27 = vadd.s32 4294967295, %v3101_v13  ;;  %v3135_v28 = vand.u32 7, %v258_v14  ;;  %v767_v30 = vshrl.u32 %v3118_v19, 16  ;;  %v770_v31 = vshll.u32 %v3118_v19, 16  ;;  %p2946_p13 = pneg %p2945_p12 }
  0x1b   : > { %v822_v25 = vadd.s32 4294967295, %v3109_v15  ;;  %v823_v26 = vadd.s32 4294967295, %v3111_v16  ;;  %v3140_v32 = vand.u32 7, %v259_v17  ;;  %v523_v33 = vadd.s32 4294967294, %v3126_v22 }
  0x1c   : > { %1247 = vmatpush.bf16.msrb.mxu2 %v2828_v6  ;;  %vm538_vm5 = vcmp.ge.s32.totalorder %v522_v23, 0  ;;  %v3151_v35 = vrot.slane %v759_v29, 7  ;;  %v3155_v36 = vrot.slane %v767_v30, 7  ;;  %v495_v37 = vrot.slane %v3124_v21, 7  ;;  %p2951_p3 = pnand %p2950_p2, %p2946_p13 }
  0x1d   : > { %1953 = vmatpush.bf16.msrb.mxu0 %v2832_v11  ;;  %vm838_vm2 = vcmp.ge.s32.totalorder %v822_v25, 0  ;;  %vm839_vm3 = vcmp.ge.s32.totalorder %v823_v26, 0  ;;  %v744_v38 = vshrl.u32 %v3124_v21, 16  ;;  %vm539_vm9 = vcmp.ge.s32.totalorder %v523_v33, 0  ;;  %vm618_vm10 = vmpackc.low %vm538_vm5, %vm538_vm5  ;;  %1604 = vmatpush.bf16.msrb.mxu3 %v2830_v53 }
  0x1e   : > { %vm918_vm7 = vmpackc.low %vm838_vm2, %vm838_vm2  ;;  %v747_v40 = vshll.u32 %v3124_v21, 16  ;;  %v817_v41 = vadd.s32 4294967295, %v3126_v22  ;;  %v772_v42 = vor.u32 %v770_v31, %v3155_v36  ;;  %v634_v47 = vsel %vm618_vm10, 65537, %v2991_v9 }
  0x1f   : > { %vm919_vm8 = vmpackc.low %vm839_vm3, %vm839_vm3  ;;  %v934_v39 = vsel %vm918_vm7, 65537, %v2991_v9  ;;  %v3168_v45 = vrot.slane %v744_v38, 7  ;;  %vm832_vm12 = vcmp.ge.s32.totalorder %v816_v27, 0  ;;  %v650_v52 = vunpack.c.l.b16 %v634_v47 }
  0x20   : > { %v935_v43 = vsel %vm919_vm8, 65537, %v2991_v9  ;;  %v950_v44 = vunpack.c.l.b16 %v934_v39  ;;  %vm619_vm11 = vmpackc.low %vm539_vm9, %vm539_vm9  ;;  %vm833_vm13 = vcmp.ge.s32.totalorder %v817_v41, 0  ;;  %v773_v49 = vsel %vm742_vm0, %v3151_v35, %v772_v42  ;;  %1248 = vmatpush.bf16.msrb.mxu2 %v2827_v54 }
  0x21   : > { %v951_v46 = vunpack.c.l.b16 %v935_v43  ;;  %v635_v51 = vsel %vm619_vm11, 65537, %v2991_v9  ;;  %vm912_vm14 = vmpackc.low %vm832_vm12, %vm832_vm12  ;;  %v749_v57 = vor.u32 %v747_v40, %v3168_v45  ;;  %v2618_v60 = vunpack.i.l.s16 %v650_v52 }
  0x22   : > { %v2640_v50 = vunpack.i.l.s16 %v950_v44  ;;  %v651_v56 = vunpack.c.l.b16 %v635_v51  ;;  %vm913_vm15 = vmpackc.low %vm833_vm13, %vm833_vm13  ;;  %v928_v58 = vsel %vm912_vm14, 65537, %v2991_v9  ;;  %v520_v63 = vsel %vm494_vm1, 0, %v495_v37 }
  0x23   : > { %v2641_v55 = vunpack.i.l.s16 %v951_v46  ;;  %v929_v61 = vsel %vm913_vm15, 65537, %v2991_v9  ;;  %v944_v62 = vunpack.c.l.b16 %v928_v58  ;;  %vm678_vm7 = vcmp.ne.s32.totalorder %v2618_v60, %v3094_v10 }
  0x24   : > { %vm993_vm2 = vcmp.ne.s32.totalorder %v2640_v50, %v3094_v10  ;;  %v2619_v0 = vunpack.i.l.s16 %v651_v56  ;;  %v945_v1 = vunpack.c.l.b16 %v929_v61  ;;  %v815_v3 = vsel %vm3145_vm6, 0, %v749_v57 }
  0x25   : > { %vm994_vm3 = vcmp.ne.s32.totalorder %v2641_v55, %v3121_v20  ;;  %v2634_v4 = vunpack.i.l.s16 %v944_v62  ;;  %v783_v6 = vshrl.u32 %v3172_v48, 16  ;;  %v791_v12 = vshrl.u32 %v3188_v59, 16  ;;  %v3245_v55 = vld [vmem:[%s3107_s30 + $0x8] sm:$0xff] }
  0x26   : > { %vm995_vm5 = vmpackc.low %vm994_vm3, %vm993_vm2  ;;  %vm679_vm8 = vcmp.ne.s32.totalorder %v2619_v0, %v3121_v20  ;;  %v2635_v11 = vunpack.i.l.s16 %v945_v1  ;;  %v794_v17 = vshll.u32 %v3188_v59, 16  ;;  %v828_v23 = vadd.s32 4294967295, %v3135_v28 }
  0x27   : > { %v1027_v8 = vsel %vm995_vm5, %v773_v49, 0  ;;  %vm680_vm9 = vmpackc.low %vm679_vm8, %vm678_vm7  ;;  %vm972_vm10 = vcmp.ne.s32.totalorder %v2634_v4, %v3094_v10  ;;  %v3209_v14 = vrot.slane %v783_v6, 7  ;;  %v3216_v26 = vrot.slane %v791_v12, 7 }
  0x28   : > { %2665 = vmatmul.msk.bf16.vlgmr.msra.gmra.mxu2 %vm1049_vm4, %v1027_v8  ;;  %v730_v25 = vsel %vm680_vm9, %v520_v63, 0  ;;  %vm973_vm6 = vcmp.ne.s32.totalorder %v2635_v11, %v3121_v20  ;;  %v829_v27 = vadd.s32 4294967295, %v3140_v32  ;;  %vm844_vm12 = vcmp.ge.s32.totalorder %v828_v23, 0 }
  0x29   : > { %2678 = vmatmul.msk.bf16.vlgmr.msra.gmra.mxu1 %vm1049_vm4, %v730_v25  ;;  %vm974_vm11 = vmpackc.low %vm973_vm6, %vm972_vm10  ;;  %v255_v33 = vadd.s32 72, %v3085_v5  ;;  %v3222_v34 = vand.u32 7, %v3130_v24  ;;  %v775_v39 = vshrl.u32 %v3201_v7, 16  ;;  %v796_v42 = vor.u32 %v794_v17, %v3216_v26 }
  0x2a   : > { %v1024_v41 = vsel %vm974_vm11, %v815_v3, 0  ;;  %vm845_vm13 = vcmp.ge.s32.totalorder %v829_v27, 0  ;;  %vm924_vm14 = vmpackc.low %vm844_vm12, %vm844_vm12  ;;  %v778_v43 = vshll.u32 %v3201_v7, 16  ;;  %v248_v51 = vadd.s32 16, %v3085_v5 }
  0x2b   : > { %2662 = vmatmul.msk.bf16.vlgmr.msra.gmra.mxu0 %vm1049_vm4, %v1024_v41  ;;  %vm925_vm15 = vmpackc.low %vm845_vm13, %vm845_vm13  ;;  %v940_v44 = vsel %vm924_vm14, 65537, %v2991_v9  ;;  %v3231_v46 = vand.u32 7, %v255_v33  ;;  %v3235_v24 = vrot.slane %v775_v39, 7  ;;  %v824_v47 = vadd.s32 4294967295, %v3222_v34 }
  0x2c   : > { %v941_v49 = vsel %vm925_vm15, 65537, %v2991_v9  ;;  %v956_v50 = vunpack.c.l.b16 %v940_v44  ;;  %v797_v56 = vsel %vm742_vm0, %v3209_v14, %v796_v42  ;;  %v249_v58 = vadd.s32 24, %v3085_v5 }
  0x2d   : > { %v957_v52 = vunpack.c.l.b16 %v941_v49  ;;  %v780_v53 = vor.u32 %v778_v43, %v3235_v24  ;;  %v825_v54 = vadd.s32 4294967295, %v3231_v46  ;;  %vm840_vm2 = vcmp.ge.s32.totalorder %v824_v47, 0  ;;  %v3274_v49 = vld [vmem:[%s3107_s30 + $0x38] sm:$0xff] }
  0x2e   : > { %v2646_v57 = vunpack.i.l.s16 %v956_v50  ;;  %vm920_vm3 = vmpackc.low %vm840_vm2, %vm840_vm2  ;;  %v3250_v60 = vand.u32 7, %v248_v51  ;;  %v496_v63 = vrot.slane %v3245_v55, 7  ;;  %v3257_v3 = vand.u32 7, %v249_v58 }
  0x2f   : > { %v2647_v61 = vunpack.i.l.s16 %v957_v52  ;;  %vm841_vm5 = vcmp.ge.s32.totalorder %v825_v54, 0  ;;  %v936_v62 = vsel %vm920_vm3, 65537, %v2991_v9  ;;  %v781_v0 = vsel %vm742_vm0, %v3155_v36, %v780_v53  ;;  %v2829_v53 = vld [vmem:[%s4074_s1 + $0x30] sm:$0xff]  ;;  %v2831_v54 = vld [vmem:[%s4074_s1 + $0x40] sm:$0xff] }
  0x30   : > { %vm1014_vm7 = vcmp.ne.s32.totalorder %v2646_v57, %v3094_v10  ;;  %vm921_vm8 = vmpackc.low %vm841_vm5, %vm841_vm5  ;;  %v952_v1 = vunpack.c.l.b16 %v936_v62  ;;  %v524_v8 = vadd.s32 4294967294, %v3250_v60  ;;  %v751_v11 = vshrl.u32 %v3245_v55, 16  ;;  %1605 = vmatpush.bf16.msrb.mxu3 %v2829_v53  ;;  %1954 = vmatpush.bf16.msrb.mxu0 %v2831_v54 }
  0x31   : > { %vm1015_vm9 = vcmp.ne.s32.totalorder %v2647_v61, %v3121_v20  ;;  %v937_v4 = vsel %vm921_vm8, 65537, %v2991_v9  ;;  %v525_v27 = vadd.s32 4294967294, %v3257_v3  ;;  %v754_v36 = vshll.u32 %v3245_v55, 16 }
  0x32   : > { %vm1016_vm10 = vmpackc.low %vm1015_vm9, %vm1014_vm7  ;;  %v953_v23 = vunpack.c.l.b16 %v937_v4  ;;  %v2642_v25 = vunpack.i.l.s16 %v952_v1  ;;  %vm540_vm6 = vcmp.ge.s32.totalorder %v524_v8, 0  ;;  %v3267_v41 = vrot.slane %v751_v11, 7 }
  0x33   : > { %v1030_v33 = vsel %vm1016_vm10, %v797_v56, 0  ;;  %v818_v42 = vadd.s32 4294967295, %v3250_v60  ;;  %vm541_vm12 = vcmp.ge.s32.totalorder %v525_v27, 0  ;;  %vm620_vm13 = vmpackc.low %vm540_vm6, %vm540_vm6  ;;  %v819_v47 = vadd.s32 4294967295, %v3257_v3 }
  0x34   : > { %2668 = vmatmul.msk.bf16.vlgmr.msra.gmra.mxu3 %vm1049_vm4, %v1030_v33  ;;  %v2643_v44 = vunpack.i.l.s16 %v953_v23  ;;  %vm1000_vm11 = vcmp.ne.s32.totalorder %v2642_v25, %v3094_v10  ;;  %v497_v50 = vsel %vm494_vm1, %v495_v37, %v496_v63  ;;  %vm621_vm14 = vmpackc.low %vm541_vm12, %vm541_vm12  ;;  %v636_v51 = vsel %vm620_vm13, 65537, %v2991_v9 }
  0x35   : > { %vm834_vm15 = vcmp.ge.s32.totalorder %v818_v42, 0  ;;  %v260_v52 = vadd.s32 112, %v3085_v5  ;;  %v637_v56 = vsel %vm621_vm14, 65537, %v2991_v9  ;;  %v652_v57 = vunpack.c.l.b16 %v636_v51 }
  0x36   : > { %vm1001_vm2 = vcmp.ne.s32.totalorder %v2643_v44, %v3121_v20  ;;  %vm835_vm3 = vcmp.ge.s32.totalorder %v819_v47, 0  ;;  %vm914_vm5 = vmpackc.low %vm834_vm15, %vm834_vm15  ;;  %v653_v37 = vunpack.c.l.b16 %v637_v56  ;;  %v756_v58 = vor.u32 %v754_v36, %v3267_v41 }
  0x37   : > { %vm1002_vm7 = vmpackc.low %vm1001_vm2, %vm1000_vm11  ;;  %v930_v61 = vsel %vm914_vm5, 65537, %v2991_v9  ;;  %v261_v62 = vadd.s32 120, %v3085_v5  ;;  %v2620_v4 = vunpack.i.l.s16 %v652_v57  ;;  %v3298_v23 = vand.u32 7, %v260_v52 }
  0x38   : > { %v1028_v1 = vsel %vm1002_vm7, %v781_v0, 0  ;;  %vm915_vm8 = vmpackc.low %vm835_vm3, %vm835_vm3  ;;  %v946_v8 = vunpack.c.l.b16 %v930_v61  ;;  %v2621_v25 = vunpack.i.l.s16 %v653_v37  ;;  %v799_v42 = vshrl.u32 %v3274_v49, 16 }
  0x39   : > { %2666 = vmatmul.msk.bf16.gmra.mxu2 %vm1049_vm4, %v1028_v1  ;;  %v931_v27 = vsel %vm915_vm8, 65537, %v2991_v9  ;;  %v3302_v33 = vand.u32 7, %v261_v62  ;;  %vm685_vm9 = vcmp.ne.s32.totalorder %v2620_v4, %v3094_v10  ;;  %v802_v0 = vshll.u32 %v3274_v49, 16 }
  0x3a   : > { %v947_v44 = vunpack.c.l.b16 %v931_v27  ;;  %v2636_v47 = vunpack.i.l.s16 %v946_v8  ;;  %vm686_vm10 = vcmp.ne.s32.totalorder %v2621_v25, %v3121_v20  ;;  %v801_v51 = vrot.slane %v799_v42, 7 }
  0x3b   : > { %v830_v52 = vadd.s32 4294967295, %v3298_v23  ;;  %v831_v53 = vadd.s32 4294967295, %v3302_v33  ;;  %vm687_vm6 = vmpackc.low %vm686_vm10, %vm685_vm9  ;;  %v256_v56 = vadd.s32 80, %v3085_v5  ;;  %v257_v57 = vadd.s32 88, %v3085_v5 }
  0x3c   : > { %v2637_v54 = vunpack.i.l.s16 %v947_v44  ;;  %vm979_vm11 = vcmp.ne.s32.totalorder %v2636_v47, %v3094_v10  ;;  %v731_v37 = vsel %vm687_vm6, %v497_v50, 0  ;;  %v757_v61 = vsel %vm742_vm0, %v3168_v45, %v756_v58 }
  0x3d   : > { %vm846_vm12 = vcmp.ge.s32.totalorder %v830_v52, 0  ;;  %vm847_vm13 = vcmp.ge.s32.totalorder %v831_v53, 0  ;;  %2679 = vmatmul.msk.bf16.gmra.mxu1 %vm1049_vm4, %v731_v37  ;;  %v804_v62 = vor.u32 %v802_v0, %v801_v51  ;;  %v3321_v1 = vand.u32 7, %v256_v56 }
  0x3e   : > { %vm980_vm14 = vcmp.ne.s32.totalorder %v2637_v54, %v3121_v20  ;;  %vm926_vm15 = vmpackc.low %vm846_vm12, %vm846_vm12  ;;  %v3323_v4 = vand.u32 7, %v257_v57  ;;  %v786_v8 = vshll.u32 %v3172_v48, 16  ;;  %v250_v45 = vadd.s32 32, %v3085_v5 }
  0x3f   : > { %vm981_vm2 = vmpackc.low %vm980_vm14, %vm979_vm11  ;;  %v942_v50 = vsel %vm926_vm15, 65537, %v2991_v9  ;;  %v251_v58 = vadd.s32 40, %v3085_v5  ;;  %v826_v44 = vadd.s32 4294967295, %v3321_v1  ;;  %v805_v54 = vsel %vm742_vm0, %v3216_v26, %v804_v62 }
  0x40   : > { %v1025_v25 = vsel %vm981_vm2, %v757_v61, 0  ;;  %vm927_vm3 = vmpackc.low %vm847_vm13, %vm847_vm13  ;;  %v958_v27 = vunpack.c.l.b16 %v942_v50  ;;  %v827_v51 = vadd.s32 4294967295, %v3323_v4  ;;  %v3333_v52 = vand.u32 7, %v250_v45 }
  0x41   : > { %2663 = vmatmul.msk.bf16.gmra.mxu0 %vm1049_vm4, %v1025_v25  ;;  %v943_v47 = vsel %vm927_vm3, 65537, %v2991_v9  ;;  %v3335_v53 = vand.u32 7, %v251_v58  ;;  %vm842_vm5 = vcmp.ge.s32.totalorder %v826_v44, 0  ;;  %v788_v57 = vor.u32 %v786_v8, %v3209_v14 }
  0x42   : > { %v959_v56 = vunpack.c.l.b16 %v943_v47  ;;  %v2648_v5 = vunpack.i.l.s16 %v958_v27  ;;  %vm843_vm7 = vcmp.ge.s32.totalorder %v827_v51, 0  ;;  %vm922_vm8 = vmpackc.low %vm842_vm5, %vm842_vm5  ;;  %v526_v37 = vadd.s32 4294967294, %v3333_v52 }
  0x43   : > { %v527_v61 = vadd.s32 4294967294, %v3335_v53  ;;  %vm923_vm10 = vmpackc.low %vm843_vm7, %vm843_vm7  ;;  %v938_v45 = vsel %vm922_vm8, 65537, %v2991_v9  ;;  %v762_v26 = vshll.u32 %v3115_v18, 16  ;;  %v498_v25 = vrot.slane %v3115_v18, 7 }
  0x44   : > { %v2649_v50 = vunpack.i.l.s16 %v959_v56  ;;  %vm1021_vm9 = vcmp.ne.s32.totalorder %v2648_v5, %v3094_v10  ;;  %v939_v62 = vsel %vm923_vm10, 65537, %v2991_v9  ;;  %v954_v58 = vunpack.c.l.b16 %v938_v45 }
  0x45   : > { %vm542_vm6 = vcmp.ge.s32.totalorder %v526_v37, 0  ;;  %v955_v14 = vunpack.c.l.b16 %v939_v62  ;;  %vm543_vm12 = vcmp.ge.s32.totalorder %v527_v61, 0  ;;  %v764_v27 = vor.u32 %v762_v26, %v3151_v35 }
  0x46   : > { %vm1022_vm11 = vcmp.ne.s32.totalorder %v2649_v50, %v3121_v20  ;;  %vm622_vm13 = vmpackc.low %vm542_vm6, %vm542_vm6  ;;  %v2644_v44 = vunpack.i.l.s16 %v954_v58  ;;  %v820_v51 = vadd.s32 4294967295, %v3333_v52  ;;  %v821_v56 = vadd.s32 4294967295, %v3335_v53 }
  0x47   : > { %vm1023_vm14 = vmpackc.low %vm1022_vm11, %vm1021_vm9  ;;  %v638_v47 = vsel %vm622_vm13, 65537, %v2991_v9  ;;  %v789_v37 = vsel %vm742_vm0, %v3235_v24, %v788_v57  ;;  %v2645_v50 = vunpack.i.l.s16 %v955_v14  ;;  %v1307_v45 = vrot.slane %v747_v40, 1 }
  0x48   : > { %v1031_v5 = vsel %vm1023_vm14, %v805_v54, 0  ;;  %vm623_vm15 = vmpackc.low %vm543_vm12, %vm543_vm12  ;;  %v654_v61 = vunpack.c.l.b16 %v638_v47  ;;  %vm1007_vm2 = vcmp.ne.s32.totalorder %v2644_v44, %v3094_v10  ;;  %vm836_vm3 = vcmp.ge.s32.totalorder %v820_v51, 0 }
  0x49   : > { %2669 = vmatmul.msk.bf16.gmra.mxu3 %vm1049_vm4, %v1031_v5  ;;  %v639_v35 = vsel %vm623_vm15, 65537, %v2991_v9  ;;  %vm837_vm5 = vcmp.ge.s32.totalorder %v821_v56, 0  ;;  %vm1008_vm7 = vcmp.ne.s32.totalorder %v2645_v50, %v3121_v20  ;;  %vm916_vm8 = vmpackc.low %vm836_vm3, %vm836_vm3  ;;  %v499_v24 = vsel %vm494_vm1, %v496_v63, %v498_v25 }
  0x4a   : > { %v655_v54 = vunpack.c.l.b16 %v639_v35  ;;  %v2622_v62 = vunpack.i.l.s16 %v654_v61  ;;  %vm1009_vm9 = vmpackc.low %vm1008_vm7, %vm1007_vm2  ;;  %v765_v57 = vsel %vm742_vm0, %v3267_v41, %v764_v27  ;;  %v932_v58 = vsel %vm916_vm8, 65537, %v2991_v9 }
  0x4b   : > { %v1341_v14 = vadd.s32 1, %v3101_v13  ;;  %v1029_v40 = vsel %vm1009_vm9, %v789_v37, 0  ;;  %vm917_vm6 = vmpackc.low %vm837_vm5, %vm837_vm5  ;;  %v948_v47 = vunpack.c.l.b16 %v932_v58  ;;  %vm1306_vm11 = vsmask.f32 7424 }
  0x4c   : > { %v2623_v44 = vunpack.i.l.s16 %v655_v54  ;;  %vm692_vm10 = vcmp.ne.s32.totalorder %v2622_v62, %v3094_v10  ;;  %2667 = vmatmul.msk.bf16.gmra.mxu2 %vm1049_vm4, %v1029_v40  ;;  %v933_v51 = vsel %vm917_vm6, 65537, %v2991_v9  ;;  %v1342_v63 = vadd.s32 1, %v3126_v22 }
  0x4d   : > { %vm1373_vm12 = vcmp.lt.s32.totalorder %v1341_v14, 8  ;;  %v949_v41 = vunpack.c.l.b16 %v933_v51  ;;  %v2638_v27 = vunpack.i.l.s16 %v948_v47  ;;  %v1308_v56 = vor.u32 %v1307_v45, %v744_v38 }
  0x4e   : > { %vm693_vm0 = vcmp.ne.s32.totalorder %v2623_v44, %v3121_v20  ;;  %vm1437_vm13 = vmpackc.low %vm1373_vm12, %vm1373_vm12  ;;  %vm1374_vm15 = vcmp.lt.s32.totalorder %v1342_v63, 8  ;;  %v528_v37 = vadd.s32 4294967294, %v3109_v15  ;;  %v529_v50 = vadd.s32 4294967294, %v3111_v16 }
  0x4f   : > { %vm694_vm14 = vmpackc.low %vm693_vm0, %vm692_vm10  ;;  %v1453_v5 = vsel %vm1437_vm13, 65537, %v2991_v9  ;;  %v2639_v35 = vunpack.i.l.s16 %v949_v41  ;;  %vm986_vm2 = vcmp.ne.s32.totalorder %v2638_v27, %v3094_v10  ;;  %v1309_v38 = vrot.slane %v754_v36, 1 }
  0x50   : > { %v732_v61 = vsel %vm694_vm14, %v499_v24, 0  ;;  %vm1438_vm3 = vmpackc.low %vm1374_vm15, %vm1374_vm15  ;;  %v1469_v54 = vunpack.c.l.b16 %v1453_v5  ;;  %vm544_vm5 = vcmp.ge.s32.totalorder %v528_v37, 0  ;;  %vm545_vm7 = vcmp.ge.s32.totalorder %v529_v50, 0 }
  0x51   : > { %2680 = vmatmul.msk.bf16.gmra.mxu1 %vm1049_vm4, %v732_v61  ;;  %v1454_v45 = vsel %vm1438_vm3, 65537, %v2991_v9  ;;  %vm987_vm8 = vcmp.ne.s32.totalorder %v2639_v35, %v3121_v20  ;;  %v500_v24 = vrot.slane %v3118_v19, 7  ;;  %vm624_vm9 = vmpackc.low %vm544_vm5, %vm544_vm5  ;;  %v1690_v40 = vadd.s32 2, %v3101_v13 }
  0x52   : > { %v1470_v62 = vunpack.c.l.b16 %v1454_v45  ;;  %v2706_v58 = vunpack.i.l.s16 %v1469_v54  ;;  %vm988_vm10 = vmpackc.low %vm987_vm8, %vm986_vm2  ;;  %v640_v14 = vsel %vm624_vm9, 65537, %v2991_v9  ;;  %v1310_v51 = vsel %vm1306_vm11, %v1308_v56, %v1309_v38 }
  0x53   : > { %v1026_v44 = vsel %vm988_vm10, %v765_v57, 0  ;;  %vm625_vm12 = vmpackc.low %vm545_vm7, %vm545_vm7  ;;  %v656_v36 = vunpack.c.l.b16 %v640_v14  ;;  %v1691_v41 = vadd.s32 2, %v3126_v22  ;;  %vm1722_vm0 = vcmp.lt.s32.totalorder %v1690_v40, 8 }
  0x54   : > { %v2707_v47 = vunpack.i.l.s16 %v1470_v62  ;;  %vm1497_vm6 = vcmp.ne.s32.totalorder %v2706_v58, %v3094_v10  ;;  %2664 = vmatmul.msk.bf16.gmra.mxu0 %vm1049_vm4, %v1026_v44  ;;  %v641_v63 = vsel %vm625_vm12, 65537, %v2991_v9  ;;  %v501_v57 = vsel %vm494_vm1, %v498_v25, %v500_v24  ;;  %vm1786_vm14 = vmpackc.low %vm1722_vm0, %vm1722_vm0 }
  0x55   : > { %v657_v27 = vunpack.c.l.b16 %v641_v63  ;;  %v2624_v5 = vunpack.i.l.s16 %v656_v36  ;;  %vm1663_vm2 = vcmask 1046528   ;;  %vm1723_vm3 = vcmp.lt.s32.totalorder %v1691_v41, 8 }
  0x56   : > { %vm1498_vm13 = vcmp.ne.s32.totalorder %v2707_v47, %v3121_v20  ;;  %v1802_v56 = vsel %vm1786_vm14, 65537, %v2991_v9  ;;  %v1343_v37 = vadd.s32 1, %v3250_v60  ;;  %vm1787_vm7 = vmpackc.low %vm1723_vm3, %vm1723_vm3  ;;  %v1664_v25 = vrot.slane %v3124_v21, 1 }
  0x57   : > { %vm1499_vm15 = vmpackc.low %vm1498_vm13, %vm1497_vm6  ;;  %v2625_v61 = vunpack.i.l.s16 %v657_v27  ;;  %vm699_vm5 = vcmp.ne.s32.totalorder %v2624_v5, %v3094_v10  ;;  %v1818_v35 = vunpack.c.l.b16 %v1802_v56  ;;  %v1803_v54 = vsel %vm1787_vm7, 65537, %v2991_v9 }
  0x58   : > { %v1549_v50 = vsel %vm1499_vm15, %v1310_v51, 0  ;;  %v1344_v45 = vadd.s32 1, %v3257_v3  ;;  %vm1375_vm8 = vcmp.lt.s32.totalorder %v1343_v37, 8  ;;  %v1665_v62 = vrot.slane %v3245_v55, 1 }
  0x59   : > { %2734 = vmatmul.msk.bf16.vlgmr.msrb.gmra.mxu3 %vm1049_vm4, %v1549_v50  ;;  %vm700_vm9 = vcmp.ne.s32.totalorder %v2625_v61, %v3121_v20  ;;  %v1819_v58 = vunpack.c.l.b16 %v1803_v54  ;;  %v2742_v14 = vunpack.i.l.s16 %v1818_v35  ;;  %vm1439_vm10 = vmpackc.low %vm1375_vm8, %vm1375_vm8  ;;  %v530_v47 = vadd.s32 4294967294, %v3222_v34 }
  0x5a   : > { %vm3412_vm6 = vmpackc.low %vm700_vm9, %vm699_vm5  ;;  %vm1376_vm12 = vcmp.lt.s32.totalorder %v1344_v45, 8  ;;  %v1455_v44 = vsel %vm1439_vm10, 65537, %v2991_v9  ;;  %v531_v36 = vadd.s32 4294967294, %v3231_v46  ;;  %v1311_v63 = vor.u32 %v1309_v38, %v751_v11 }
  0x5b   : > { %v2743_v51 = vunpack.i.l.s16 %v1819_v58  ;;  %vm1846_vm0 = vcmp.ne.s32.totalorder %v2742_v14, %v3094_v10  ;;  %vm1440_vm13 = vmpackc.low %vm1376_vm12, %vm1376_vm12  ;;  %v1471_v41 = vunpack.c.l.b16 %v1455_v44  ;;  %v3426_v27 = vrot.slane %v762_v26, 1 }
  0x5c   : > { %2698 = vmatmul.msk.bf16.vlgmr.msrb.gmra.mxu2 %vm1049_vm4, %v3124_v21  ;;  %v1456_v5 = vsel %vm1440_vm13, 65537, %v2991_v9  ;;  %vm546_vm14 = vcmp.ge.s32.totalorder %v530_v47, 0  ;;  %vm547_vm15 = vcmp.ge.s32.totalorder %v531_v36, 0  ;;  %v733_v56 = vsel %vm3412_vm6, %v501_v57, 0 }
  0x5d   : > { %vm1847_vm3 = vcmp.ne.s32.totalorder %v2743_v51, %v3121_v20  ;;  %v1472_v37 = vunpack.c.l.b16 %v1456_v5  ;;  %v2708_v11 = vunpack.i.l.s16 %v1471_v41  ;;  %vm626_vm5 = vmpackc.low %vm546_vm14, %vm546_vm14  ;;  %v1666_v21 = vsel %vm1663_vm2, %v1664_v25, %v1665_v62 }
  0x5e   : > { %vm3437_vm7 = vmpackc.low %vm1847_vm3, %vm1846_vm0  ;;  %v642_v38 = vsel %vm626_vm5, 65537, %v2991_v9  ;;  %v1692_v50 = vadd.s32 2, %v3250_v60  ;;  %v1693_v57 = vadd.s32 2, %v3257_v3  ;;  %v1313_v45 = vsel %vm1306_vm11, %v1311_v63, %v3426_v27 }
  0x5f   : > { %v2709_v61 = vunpack.i.l.s16 %v1472_v37  ;;  %vm1504_vm8 = vcmp.ne.s32.totalorder %v2708_v11, %v3094_v10  ;;  %vm627_vm9 = vmpackc.low %vm547_vm15, %vm547_vm15  ;;  %v658_v35 = vunpack.c.l.b16 %v642_v38  ;;  %v1898_v54 = vsel %vm3437_vm7, %v1666_v21, 0 }
  0x60   : > { %v643_v25 = vsel %vm627_vm9, 65537, %v2991_v9  ;;  %vm1724_vm10 = vcmp.lt.s32.totalorder %v1692_v50, 8  ;;  %vm1725_vm6 = vcmp.lt.s32.totalorder %v1693_v57, 8  ;;  %v1345_v47 = vadd.s32 1, %v3333_v52 }
  0x61   : > { %2681 = vmatmul.msk.bf16.gmra.mxu1 %vm1049_vm4, %v733_v56  ;;  %vm1505_vm12 = vcmp.ne.s32.totalorder %v2709_v61, %v3121_v20  ;;  %v659_v58 = vunpack.c.l.b16 %v643_v25  ;;  %vm1788_vm0 = vmpackc.low %vm1724_vm10, %vm1724_vm10  ;;  %v2626_v40 = vunpack.i.l.s16 %v658_v35  ;;  %v1346_v36 = vadd.s32 1, %v3335_v53 }
  0x62   : > { %vm3452_vm13 = vmpackc.low %vm1505_vm12, %vm1504_vm8  ;;  %v1804_v44 = vsel %vm1788_vm0, 65537, %v2991_v9  ;;  %vm1377_vm15 = vcmp.lt.s32.totalorder %v1345_v47, 8  ;;  %v502_v56 = vrot.slane %v3201_v7, 7  ;;  %v532_v21 = vadd.s32 4294967294, %v3321_v1 }
  0x63   : > { %v2627_v51 = vunpack.i.l.s16 %v659_v58  ;;  %vm1789_vm14 = vmpackc.low %vm1725_vm6, %vm1725_vm6  ;;  %v1820_v41 = vunpack.c.l.b16 %v1804_v44  ;;  %vm1378_vm3 = vcmp.lt.s32.totalorder %v1346_v36, 8  ;;  %v1550_v5 = vsel %vm3452_vm13, %v1313_v45, 0 }
  0x64   : > { %2770 = vmatmul.msk.bf16.vlgmr.msrb.gmra.mxu0 %vm1049_vm4, %v1898_v54  ;;  %v1805_v63 = vsel %vm1789_vm14, 65537, %v2991_v9  ;;  %vm1441_vm5 = vmpackc.low %vm1377_vm15, %vm1377_vm15  ;;  %vm706_vm7 = vcmp.ne.s32.totalorder %v2626_v40, %v3094_v10  ;;  %v533_v26 = vadd.s32 4294967294, %v3323_v4  ;;  %vm548_vm10 = vcmp.ge.s32.totalorder %v532_v21, 0 }
  0x65   : > { %v1821_v37 = vunpack.c.l.b16 %v1805_v63  ;;  %v1457_v11 = vsel %vm1441_vm5, 65537, %v2991_v9  ;;  %vm707_vm8 = vcmp.ne.s32.totalorder %v2627_v51, %v3121_v20  ;;  %v2744_v38 = vunpack.i.l.s16 %v1820_v41  ;;  %vm1442_vm9 = vmpackc.low %vm1378_vm3, %vm1378_vm3 }
  0x66   : > { %v1473_v57 = vunpack.c.l.b16 %v1457_v11  ;;  %v1458_v61 = vsel %vm1442_vm9, 65537, %v2991_v9  ;;  %vm549_vm6 = vcmp.ge.s32.totalorder %v533_v26, 0  ;;  %vm628_vm12 = vmpackc.low %vm548_vm10, %vm548_vm10  ;;  %v1694_v25 = vadd.s32 2, %v3333_v52 }
  0x67   : > { %v2745_v50 = vunpack.i.l.s16 %v1821_v37  ;;  %v1474_v35 = vunpack.c.l.b16 %v1458_v61  ;;  %v503_v54 = vsel %vm494_vm1, %v500_v24, %v502_v56  ;;  %vm3479_vm0 = vmpackc.low %vm707_vm8, %vm706_vm7  ;;  %v1667_v58 = vrot.slane %v3115_v18, 1 }
  0x68   : > { %v1695_v14 = vadd.s32 2, %v3335_v53  ;;  %vm1853_vm13 = vcmp.ne.s32.totalorder %v2744_v38, %v3094_v10  ;;  %v2710_v44 = vunpack.i.l.s16 %v1473_v57  ;;  %vm629_vm15 = vmpackc.low %vm549_vm6, %vm549_vm6  ;;  %v644_v24 = vsel %vm628_vm12, 65537, %v2991_v9 }
  0x69   : > { %2735 = vmatmul.msk.bf16.gmra.mxu3 %vm1049_vm4, %v1550_v5  ;;  %vm1854_vm14 = vcmp.ne.s32.totalorder %v2745_v50, %v3121_v20  ;;  %v2711_v47 = vunpack.i.l.s16 %v1474_v35  ;;  %v645_v40 = vsel %vm629_vm15, 65537, %v2991_v9  ;;  %vm1726_vm3 = vcmp.lt.s32.totalorder %v1694_v25, 8 }
  0x6a   : > { %vm1727_vm5 = vcmp.lt.s32.totalorder %v1695_v14, 8  ;;  %v734_v36 = vsel %vm3479_vm0, %v503_v54, 0  ;;  %v1314_v51 = vor.u32 %v3426_v27, %v759_v29  ;;  %vm1790_vm7 = vmpackc.low %vm1726_vm3, %vm1726_vm3  ;;  %v1347_v41 = vadd.s32 1, %v3109_v15 }
  0x6b   : > { %v1668_v63 = vsel %vm1663_vm2, %v1665_v62, %v1667_v58  ;;  %vm3504_vm8 = vmpackc.low %vm1854_vm14, %vm1853_vm13  ;;  %v3510_v37 = vrot.slane %v770_v31, 1  ;;  %v1806_v29 = vsel %vm1790_vm7, 65537, %v2991_v9  ;;  %v1348_v27 = vadd.s32 1, %v3111_v16 }
  0x6c   : > { %2699 = vmatmul.msk.bf16.gmra.mxu2 %vm1049_vm4, %v3245_v55  ;;  %vm1511_vm9 = vcmp.ne.s32.totalorder %v2710_v44, %v3094_v10  ;;  %vm1512_vm10 = vcmp.ne.s32.totalorder %v2711_v47, %v3121_v20  ;;  %v660_v55 = vunpack.c.l.b16 %v644_v24  ;;  %v661_v62 = vunpack.c.l.b16 %v645_v40  ;;  %vm1791_vm6 = vmpackc.low %vm1727_vm5, %vm1727_vm5 }
  0x6d   : > { %v1807_v11 = vsel %vm1791_vm6, 65537, %v2991_v9  ;;  %vm1379_vm12 = vcmp.lt.s32.totalorder %v1347_v41, 8  ;;  %vm1380_vm0 = vcmp.lt.s32.totalorder %v1348_v27, 8  ;;  %v1899_v31 = vsel %vm3504_vm8, %v1668_v63, 0  ;;  %vm3523_vm14 = vmpackc.low %vm1512_vm10, %vm1511_vm9 }
  0x6e   : > { %v1822_v21 = vunpack.c.l.b16 %v1806_v29  ;;  %vm1443_vm13 = vmpackc.low %vm1379_vm12, %vm1379_vm12  ;;  %v534_v26 = vadd.s32 4294967294, %v3135_v28  ;;  %v1316_v38 = vsel %vm1306_vm11, %v1314_v51, %v3510_v37  ;;  %v1823_v57 = vunpack.c.l.b16 %v1807_v11 }
  0x6f   : > { %v535_v61 = vadd.s32 4294967294, %v3140_v32  ;;  %v2628_v35 = vunpack.i.l.s16 %v660_v55  ;;  %v2629_v25 = vunpack.i.l.s16 %v661_v62  ;;  %vm1444_vm15 = vmpackc.low %vm1380_vm0, %vm1380_vm0  ;;  %v504_v54 = vrot.slane %v3172_v48, 7 }
  0x70   : > { %v1459_v45 = vsel %vm1443_vm13, 65537, %v2991_v9  ;;  %v1460_v14 = vsel %vm1444_vm15, 65537, %v2991_v9  ;;  %v1551_v44 = vsel %vm3523_vm14, %v1316_v38, 0  ;;  %v2746_v47 = vunpack.i.l.s16 %v1822_v21 }
  0x71   : > { %2682 = vmatmul.msk.bf16.gmra.mxu1 %vm1049_vm4, %v734_v36  ;;  %vm550_vm3 = vcmp.ge.s32.totalorder %v534_v26, 0  ;;  %v1696_v24 = vadd.s32 2, %v3109_v15  ;;  %v2747_v40 = vunpack.i.l.s16 %v1823_v57  ;;  %v1318_v36 = vrot.slane %v778_v43, 1 }
  0x72   : > { %vm551_vm5 = vcmp.ge.s32.totalorder %v535_v61, 0  ;;  %v1697_v51 = vadd.s32 2, %v3111_v16  ;;  %vm713_vm7 = vcmp.ne.s32.totalorder %v2628_v35, %v3094_v10  ;;  %vm714_vm8 = vcmp.ne.s32.totalorder %v2629_v25, %v3121_v20  ;;  %vm630_vm9 = vmpackc.low %vm550_vm3, %vm550_vm3 }
  0x73   : > { %v1475_v41 = vunpack.c.l.b16 %v1459_v45  ;;  %v1476_v63 = vunpack.c.l.b16 %v1460_v14  ;;  %v1320_v5 = vor.u32 %v1318_v36, %v775_v39  ;;  %v3545_v29 = vrot.slane %v786_v8, 1  ;;  %vm631_vm6 = vmpackc.low %vm551_vm5, %vm551_vm5 }
  0x74   : > { %2771 = vmatmul.msk.bf16.gmra.mxu0 %vm1049_vm4, %v1899_v31  ;;  %v505_v43 = vsel %vm494_vm1, %v502_v56, %v504_v54  ;;  %v1669_v27 = vrot.slane %v3118_v19, 1  ;;  %vm1860_vm10 = vcmp.ne.s32.totalorder %v2746_v47, %v3094_v10  ;;  %vm1728_vm12 = vcmp.lt.s32.totalorder %v1696_v24, 8  ;;  %vm3554_vm0 = vmpackc.low %vm714_vm8, %vm713_vm7 }
  0x75   : > { %vm1861_vm13 = vcmp.ne.s32.totalorder %v2747_v40, %v3121_v20  ;;  %vm1729_vm14 = vcmp.lt.s32.totalorder %v1697_v51, 8  ;;  %v3561_v39 = vsel %vm1306_vm11, %v1320_v5, %v3545_v29  ;;  %v1349_v8 = vadd.s32 1, %v3222_v34  ;;  %vm1792_vm15 = vmpackc.low %vm1728_vm12, %vm1728_vm12 }
  0x76   : > { %v2712_v56 = vunpack.i.l.s16 %v1475_v41  ;;  %v2713_v62 = vunpack.i.l.s16 %v1476_v63  ;;  %v646_v11 = vsel %vm630_vm9, 65537, %v2991_v9  ;;  %v1350_v31 = vadd.s32 1, %v3231_v46  ;;  %vm1793_vm3 = vmpackc.low %vm1729_vm14, %vm1729_vm14 }
  0x77   : > { %v647_v21 = vsel %vm631_vm6, 65537, %v2991_v9  ;;  %v735_v26 = vsel %vm3554_vm0, %v505_v43, 0  ;;  %vm1381_vm5 = vcmp.lt.s32.totalorder %v1349_v8, 8  ;;  %v1670_v38 = vsel %vm1663_vm2, %v1667_v58, %v1669_v27  ;;  %vm3580_vm7 = vmpackc.low %vm1861_vm13, %vm1860_vm10 }
  0x78   : > { %v1317_v57 = vor.u32 %v3510_v37, %v767_v30  ;;  %v662_v61 = vunpack.c.l.b16 %v646_v11  ;;  %vm1382_vm8 = vcmp.lt.s32.totalorder %v1350_v31, 8  ;;  %vm1518_vm9 = vcmp.ne.s32.totalorder %v2712_v56, %v3094_v10  ;;  %vm1445_vm10 = vmpackc.low %vm1381_vm5, %vm1381_vm5 }
  0x79   : > { %2736 = vmatmul.msk.bf16.gmra.mxu3 %vm1049_vm4, %v1551_v44  ;;  %vm1519_vm6 = vcmp.ne.s32.totalorder %v2713_v62, %v3121_v20  ;;  %v1808_v58 = vsel %vm1792_vm15, 65537, %v2991_v9  ;;  %v1809_v35 = vsel %vm1793_vm3, 65537, %v2991_v9  ;;  %v1900_v25 = vsel %vm3580_vm7, %v1670_v38, 0  ;;  %vm1446_vm12 = vmpackc.low %vm1382_vm8, %vm1382_vm8 }
  0x7a   : > { %v536_v30 = vadd.s32 4294967294, %v3298_v23  ;;  %v1319_v37 = vsel %vm1306_vm11, %v1317_v57, %v1318_v36  ;;  %vm3596_vm0 = vmpackc.low %vm1519_vm6, %vm1518_vm9  ;;  %v2630_v14 = vunpack.i.l.s16 %v662_v61  ;;  %v1824_v44 = vunpack.c.l.b16 %v1808_v58  ;;  %v2922_v61 = vld [vmem:[%s3107_s30 + $0x18] sm:$0xff] }
  0x7b   : > { %v537_v47 = vadd.s32 4294967294, %v3302_v33  ;;  %v1825_v40 = vunpack.c.l.b16 %v1809_v35  ;;  %v1461_v51 = vsel %vm1445_vm10, 65537, %v2991_v9  ;;  %v1462_v41 = vsel %vm1446_vm12, 65537, %v2991_v9 }
  0x7c   : > { %2700 = vmatmul.msk.bf16.gmra.mxu2 %vm1049_vm4, %v3115_v18  ;;  %v663_v18 = vunpack.c.l.b16 %v647_v21  ;;  %v1552_v63 = vsel %vm3596_vm0, %v1319_v37, 0  ;;  %v506_v36 = vrot.slane %v3188_v59, 7  ;;  %vm552_vm13 = vcmp.ge.s32.totalorder %v536_v30, 0 }
  0x7d   : > { %v1698_v5 = vadd.s32 2, %v3222_v34  ;;  %vm720_vm14 = vcmp.ne.s32.totalorder %v2630_v14, %v3094_v10  ;;  %v2748_v43 = vunpack.i.l.s16 %v1824_v44  ;;  %vm553_vm15 = vcmp.ge.s32.totalorder %v537_v47, 0  ;;  %vm632_vm5 = vmpackc.low %vm552_vm13, %vm552_vm13 }
  0x7e   : > { %v2631_v24 = vunpack.i.l.s16 %v663_v18  ;;  %v1699_v55 = vadd.s32 2, %v3231_v46  ;;  %v2749_v8 = vunpack.i.l.s16 %v1825_v40  ;;  %v1477_v56 = vunpack.c.l.b16 %v1461_v51  ;;  %vm633_vm7 = vmpackc.low %vm553_vm15, %vm553_vm15 }
  0x7f   : > { %v1478_v62 = vunpack.c.l.b16 %v1462_v41  ;;  %v507_v11 = vsel %vm494_vm1, %v504_v54, %v506_v36  ;;  %vm1730_vm8 = vcmp.lt.s32.totalorder %v1698_v5, 8  ;;  %v1351_v31 = vadd.s32 1, %v3321_v1 }
  0x80   : > { %vm721_vm3 = vcmp.ne.s32.totalorder %v2631_v24, %v3121_v20  ;;  %vm1867_vm6 = vcmp.ne.s32.totalorder %v2748_v43, %v3094_v10  ;;  %vm1731_vm10 = vcmp.lt.s32.totalorder %v1699_v55, 8  ;;  %v1352_v38 = vadd.s32 1, %v3323_v4  ;;  %vm1794_vm0 = vmpackc.low %vm1730_vm8, %vm1730_vm8 }
  0x81   : > { %2683 = vmatmul.msk.bf16.gmra.mxu1 %vm1049_vm4, %v735_v26  ;;  %vm3618_vm9 = vmpackc.low %vm721_vm3, %vm720_vm14  ;;  %v1671_v26 = vrot.slane %v3201_v7, 1  ;;  %vm1868_vm12 = vcmp.ne.s32.totalorder %v2749_v8, %v3121_v20  ;;  %v2714_v50 = vunpack.i.l.s16 %v1477_v56  ;;  %v2715_v57 = vunpack.i.l.s16 %v1478_v62 }
  0x82   : > { %v648_v54 = vsel %vm632_vm5, 65537, %v2991_v9  ;;  %v649_v18 = vsel %vm633_vm7, 65537, %v2991_v9  ;;  %v736_v58 = vsel %vm3618_vm9, %v507_v11, 0  ;;  %vm1795_vm13 = vmpackc.low %vm1731_vm10, %vm1731_vm10  ;;  %vm1383_vm14 = vcmp.lt.s32.totalorder %v1351_v31, 8 }
  0x83   : > { %v1672_v35 = vsel %vm1663_vm2, %v1669_v27, %v1671_v26  ;;  %vm3639_vm15 = vmpackc.low %vm1868_vm12, %vm1867_vm6  ;;  %v664_v30 = vunpack.c.l.b16 %v648_v54  ;;  %vm1384_vm3 = vcmp.lt.s32.totalorder %v1352_v38, 8  ;;  %vm1525_vm5 = vcmp.ne.s32.totalorder %v2714_v50, %v3094_v10  ;;  %v2923_v38 = vld [vmem:[%s3107_s30 + $0x28] sm:$0xff] }
  0x84   : > { %2772 = vmatmul.msk.bf16.gmra.mxu0 %vm1049_vm4, %v1900_v25  ;;  %vm1526_vm7 = vcmp.ne.s32.totalorder %v2715_v57, %v3121_v20  ;;  %v665_v37 = vunpack.c.l.b16 %v649_v18  ;;  %v1810_v45 = vsel %vm1794_vm0, 65537, %v2991_v9  ;;  %v1811_v19 = vsel %vm1795_vm13, 65537, %v2991_v9  ;;  %vm1447_vm8 = vmpackc.low %vm1383_vm14, %vm1383_vm14  ;;  %v2924_v18 = vld [vmem:[%s3107_s30 + $0x20] sm:$0xff] }
  0x85   : > { %v1901_v27 = vsel %vm3639_vm15, %v1672_v35, 0  ;;  %vm1448_vm9 = vmpackc.low %vm1384_vm3, %vm1384_vm3  ;;  %v2632_v44 = vunpack.i.l.s16 %v664_v30  ;;  %v1826_v47 = vunpack.c.l.b16 %v1810_v45  ;;  %v1827_v40 = vunpack.c.l.b16 %v1811_v19 }
  0x86   : > { %vm3650_vm6 = vmpackc.low %vm1526_vm7, %vm1525_vm5  ;;  %v2633_v24 = vunpack.i.l.s16 %v665_v37  ;;  %v1463_v51 = vsel %vm1447_vm8, 65537, %v2991_v9  ;;  %v1464_v41 = vsel %vm1448_vm9, 65537, %v2991_v9  ;;  %v1700_v5 = vadd.s32 2, %v3321_v1 }
  0x87   : > { %v508_v43 = vrot.slane %v3274_v49, 7  ;;  %vm727_vm10 = vcmp.ne.s32.totalorder %v2632_v44, %v3094_v10  ;;  %v2750_v55 = vunpack.i.l.s16 %v1826_v47  ;;  %v1701_v8 = vadd.s32 2, %v3323_v4 }
  0x88   : > { %vm728_vm12 = vcmp.ne.s32.totalorder %v2633_v24, %v3121_v20  ;;  %v2751_v56 = vunpack.i.l.s16 %v1827_v40  ;;  %v1479_v62 = vunpack.c.l.b16 %v1463_v51  ;;  %v1480_v11 = vunpack.c.l.b16 %v1464_v41 }
  0x89   : > { %2737 = vmatmul.msk.bf16.gmra.mxu3 %vm1049_vm4, %v1552_v63  ;;  %v1553_v63 = vsel %vm3650_vm6, %v3561_v39, 0  ;;  %vm1732_vm0 = vcmp.lt.s32.totalorder %v1700_v5, 8  ;;  %v1353_v39 = vadd.s32 1, %v3135_v28  ;;  %v509_v31 = vsel %vm494_vm1, %v506_v36, %v508_v43  ;;  %vm3670_vm13 = vmpackc.low %vm728_vm12, %vm727_vm10 }
  0x8a   : > { %v1673_v50 = vrot.slane %v2923_v38, 1  ;;  %vm1733_vm14 = vcmp.lt.s32.totalorder %v1701_v8, 8  ;;  %v1354_v57 = vadd.s32 1, %v3140_v32  ;;  %vm1874_vm15 = vcmp.ne.s32.totalorder %v2750_v55, %v3094_v10  ;;  %vm1796_vm5 = vmpackc.low %vm1732_vm0, %vm1732_vm0  ;;  %v2925_v8 = vld [vmem:[%s3107_s30 + $0x30] sm:$0xff] }
  0x8b   : > { %vm1875_vm3 = vcmp.ne.s32.totalorder %v2751_v56, %v3121_v20  ;;  %v2716_v54 = vunpack.i.l.s16 %v1479_v62  ;;  %v737_v36 = vsel %vm3670_vm13, %v509_v31, 0  ;;  %vm1797_vm1 = vmpackc.low %vm1733_vm14, %vm1733_vm14  ;;  %vm1385_vm7 = vcmp.lt.s32.totalorder %v1353_v39, 8 }
  0x8c   : > { %2701 = vmatmul.msk.bf16.gmra.mxu2 %vm1049_vm4, %v2922_v61  ;;  %v2717_v61 = vunpack.i.l.s16 %v1480_v11  ;;  %vm3685_vm8 = vmpackc.low %vm1875_vm3, %vm1874_vm15  ;;  %v1323_v25 = vor.u32 %v3545_v29, %v783_v6  ;;  %v1324_v30 = vrot.slane %v794_v17, 1  ;;  %vm1386_vm9 = vcmp.lt.s32.totalorder %v1354_v57, 8 }
  0x8d   : > { %vm1532_vm6 = vcmp.ne.s32.totalorder %v2716_v54, %v3094_v10  ;;  %v1812_v7 = vsel %vm1796_vm5, 65537, %v2991_v9  ;;  %vm1449_vm12 = vmpackc.low %vm1385_vm7, %vm1385_vm7  ;;  %v1702_v44 = vadd.s32 2, %v3135_v28  ;;  %v1703_v47 = vadd.s32 2, %v3140_v32 }
  0x8e   : > { %vm1533_vm10 = vcmp.ne.s32.totalorder %v2717_v61, %v3121_v20  ;;  %vm1450_vm0 = vmpackc.low %vm1386_vm9, %vm1386_vm9  ;;  %v1325_v6 = vsel %vm1306_vm11, %v1323_v25, %v1324_v30  ;;  %v1828_v29 = vunpack.c.l.b16 %v1812_v7  ;;  %v1465_v45 = vsel %vm1449_vm12, 65537, %v2991_v9 }
  0x8f   : > { %vm3702_vm13 = vmpackc.low %vm1533_vm10, %vm1532_vm6  ;;  %v1466_v19 = vsel %vm1450_vm0, 65537, %v2991_v9  ;;  %v1481_v41 = vunpack.c.l.b16 %v1465_v45  ;;  %vm1734_vm14 = vcmp.lt.s32.totalorder %v1702_v44, 8  ;;  %v1355_v55 = vadd.s32 1, %v3298_v23 }
  0x90   : > { %v2752_v40 = vunpack.i.l.s16 %v1828_v29  ;;  %v1675_v56 = vrot.slane %v2925_v8, 1  ;;  %vm1735_vm15 = vcmp.lt.s32.totalorder %v1703_v47, 8  ;;  %v1356_v62 = vadd.s32 1, %v3302_v33 }
  0x91   : > { %2684 = vmatmul.msk.bf16.gmra.mxu1 %vm1049_vm4, %v736_v58  ;;  %v1674_v58 = vsel %vm1663_vm2, %v1671_v26, %v1673_v50  ;;  %v1813_v26 = vsel %vm1797_vm1, 65537, %v2991_v9  ;;  %v2718_v11 = vunpack.i.l.s16 %v1481_v41  ;;  %vm1798_vm1 = vmpackc.low %vm1734_vm14, %vm1734_vm14  ;;  %v1326_v57 = vor.u32 %v1324_v30, %v791_v12 }
  0x92   : > { %v1902_v48 = vsel %vm3685_vm8, %v1674_v58, 0  ;;  %v1829_v37 = vunpack.c.l.b16 %v1813_v26  ;;  %vm1881_vm3 = vcmp.ne.s32.totalorder %v2752_v40, %v3094_v10  ;;  %vm1799_vm7 = vmpackc.low %vm1735_vm15, %vm1735_vm15  ;;  %vm1387_vm8 = vcmp.lt.s32.totalorder %v1355_v55, 8 }
  0x93   : > { %v1676_v31 = vsel %vm1663_vm2, %v1673_v50, %v1675_v56  ;;  %v1327_v54 = vrot.slane %v802_v0, 1  ;;  %vm1388_vm6 = vcmp.lt.s32.totalorder %v1356_v62, 8  ;;  %vm1539_vm10 = vcmp.ne.s32.totalorder %v2718_v11, %v3094_v10  ;;  %vm1451_vm0 = vmpackc.low %vm1387_vm8, %vm1387_vm8 }
  0x94   : > { %2773 = vmatmul.msk.bf16.gmra.mxu0 %vm1049_vm4, %v1901_v27  ;;  %v1554_v27 = vsel %vm3702_vm13, %v1325_v6, 0  ;;  %v2753_v51 = vunpack.i.l.s16 %v1829_v37  ;;  %v1814_v50 = vsel %vm1798_vm1, 65537, %v2991_v9  ;;  %vm1452_vm13 = vmpackc.low %vm1388_vm6, %vm1388_vm6  ;;  %v1467_v25 = vsel %vm1451_vm0, 65537, %v2991_v9 }
  0x95   : > { %v1328_v0 = vsel %vm1306_vm11, %v1326_v57, %v1327_v54  ;;  %v1830_v58 = vunpack.c.l.b16 %v1814_v50  ;;  %v1468_v30 = vsel %vm1452_vm13, 65537, %v2991_v9  ;;  %v1704_v26 = vadd.s32 2, %v3298_v23 }
  0x96   : > { %vm1882_vm5 = vcmp.ne.s32.totalorder %v2753_v51, %v3121_v20  ;;  %v1483_v37 = vunpack.c.l.b16 %v1467_v25  ;;  %v1484_v45 = vunpack.c.l.b16 %v1468_v30 }
  0x97   : > { %vm3725_vm9 = vmpackc.low %vm1882_vm5, %vm1881_vm3  ;;  %v2754_v17 = vunpack.i.l.s16 %v1830_v58  ;;  %vm1736_vm15 = vcmp.lt.s32.totalorder %v1704_v26, 8 }
  0x98   : > { %v1903_v59 = vsel %vm3725_vm9, %v1676_v31, 0  ;;  %v2720_v47 = vunpack.i.l.s16 %v1483_v37  ;;  %vm1800_vm8 = vmpackc.low %vm1736_vm15, %vm1736_vm15 }
  0x99   : > { %2738 = vmatmul.msk.bf16.gmra.mxu3 %vm1049_vm4, %v1553_v63  ;;  %v1482_v63 = vunpack.c.l.b16 %v1466_v19  ;;  %vm1888_vm5 = vcmp.ne.s32.totalorder %v2754_v17, %v3094_v10  ;;  %v1816_v55 = vsel %vm1800_vm8, 65537, %v2991_v9  ;;  %vm2171_vm8 = vcmp.eq.s32.totalorder %v3126_v22, 7 }
  0x9a   : > { %v1832_v31 = vunpack.c.l.b16 %v1816_v55 }
  0x9b   : > { %v2719_v39 = vunpack.i.l.s16 %v1482_v63  ;;  %v1329_v63 = vor.u32 %v1327_v54, %v799_v42 }
  0x9c   : > { %2702 = vmatmul.msk.bf16.gmra.mxu2 %vm1049_vm4, %v2924_v18 }
  0x9d   : > { %vm1540_vm12 = vcmp.ne.s32.totalorder %v2719_v39, %v3121_v20 }
  0x9e   : > { %vm1541_vm14 = vmpackc.low %vm1540_vm12, %vm1539_vm10  ;;  %vm1546_vm12 = vcmp.ne.s32.totalorder %v2720_v47, %v3094_v10 }
  0x9f   : > { %v1555_v7 = vsel %vm1541_vm14, %v1328_v0, 0 }
  0xa1   : > { %2685 = vmatmul.msk.bf16.gmra.mxu1 %vm1049_vm4, %v737_v36  ;;  %v1815_v36 = vsel %vm1799_vm7, 65537, %v2991_v9  ;;  %vm1338_vm7 = vcmask 1047552  }
  0xa2   : > { %v1831_v35 = vunpack.c.l.b16 %v1815_v36  ;;  %vm1339_vm10 = vmand %vm1338_vm7, %vm1306_vm11 }
  0xa3   : > { %v1340_v39 = vsel %vm1339_vm10, %v1329_v63, 0 }
  0xa4   : > { %2774 = vmatmul.msk.bf16.gmra.mxu0 %vm1049_vm4, %v1902_v48  ;;  %v1705_v48 = vadd.s32 2, %v3302_v33  ;;  %v2755_v29 = vunpack.i.l.s16 %v1831_v35 }
  0xa6   : > { %v1168_v14 = vpop.f32.mrf.mxu1  ;;  %vm1737_vm3 = vcmp.lt.s32.totalorder %v1705_v48, 8  ;;  %vm1889_vm1 = vcmp.ne.s32.totalorder %v2755_v29, %v3121_v20 }
  0xa7   : > { %vm1801_vm9 = vmpackc.low %vm1737_vm3, %vm1737_vm3 }
  0xa8   : > { %v1083_v24 = vpop.f32.mrf.mxu0  ;;  %vm1890_vm6 = vmpackc.low %vm1889_vm1, %vm1888_vm5  ;;  %vm2170_vm1 = vcmp.eq.s32.totalorder %v3101_v13, 7 }
  0xa9   : > { %2739 = vmatmul.msk.bf16.gmra.mxu3 %vm1049_vm4, %v1554_v27  ;;  %v3714_v5 = vadd.f32 %v1168_v14, %v1083_v24  ;;  %v2926_v27 = vld [vmem:[%s3107_s30 + $0x38] sm:$0xff]  ;;  %v2721_v24 = vunpack.i.l.s16 %v1484_v45 }
  0xaa   : > { %v1677_v14 = vrot.slane %v2926_v27, 1 }
  0xab   : > { %v3716_v43 = vpop.f32.mrf.mxu2  ;;  %vm1547_vm0 = vcmp.ne.s32.totalorder %v2721_v24, %v3121_v20 }
  0xac   : > { %2703 = vmatmul.msk.bf16.gmra.mxu2 %vm1049_vm4, %v2923_v38  ;;  %v1678_v41 = vsel %vm1663_vm2, %v1675_v56, %v1677_v14  ;;  %vm1548_vm13 = vmpackc.low %vm1547_vm0, %vm1546_vm12  ;;  %v1688_v36 = vsel %vm1663_vm2, %v1677_v14, 0  ;;  %v3803_v14 = vand.u32 127, %v245_v2  ;;  %vm2173_vm12 = vcmp.eq.s32.totalorder %v3257_v3, 7 }
  0xad   : > { %v1904_v62 = vsel %vm1890_vm6, %v1678_v41, 0  ;;  %v1556_v42 = vsel %vm1548_vm13, %v1340_v39, 0  ;;  %vm2172_vm6 = vcmp.eq.s32.totalorder %v3250_v60, 7  ;;  %vm2414_vm13 = vcmask 1041409  }
  0xae   : > { %v1170_v61 = vpop.f32.mrf.mxu1  ;;  %vm2035_vm2 = vcmp.ge.s32.totalorder %v3803_v14, 16  ;;  %vm2036_vm3 = vcmp.lt.s32.totalorder %v3803_v14, 32 }
  0xaf   : > { %vm3816_vm5 = vmand %vm2035_vm2, %vm2036_vm3  ;;  %vm2175_vm2 = vcmp.eq.s32.totalorder %v3335_v53, 7 }
  0xb0   : > { %v1085_v18 = vpop.f32.mrf.mxu0  ;;  %vm2218_vm7 = vmand %vm2170_vm1, %vm3816_vm5  ;;  %vm2418_vm1 = vcmask 1043459  }
  0xb1   : > { %v3735_v38 = vadd.f32 %v1170_v61, %v1085_v18  ;;  %v2756_v61 = vunpack.i.l.s16 %v1832_v31  ;;  %vm2220_vm10 = vmand %vm2172_vm6, %vm3816_vm5  ;;  %vm2177_vm6 = vcmp.eq.s32.totalorder %v3111_v16, 7 }
  0xb2   : > { %vm2221_vm0 = vmand %vm2173_vm12, %vm3816_vm5  ;;  %vm2422_vm12 = vcmask 1045509  }
  0xb3   : > { %v3741_v12 = vpop.f32.mrf.mxu2  ;;  %vm1895_vm11 = vcmp.ne.s32.totalorder %v2756_v61, %v3094_v10  ;;  %vm2223_vm3 = vmand %vm2175_vm2, %vm3816_vm5  ;;  %vm2179_vm2 = vcmp.eq.s32.totalorder %v3231_v46, 7 }
  0xb4   : > { %2775 = vmatmul.msk.bf16.gmra.mxu0 %vm1049_vm4, %v1903_v59 }
  0xb7   : > { %v3749_v6 = vpop.f32.mrf.mxu3 }
  0xb9   : > { %2740 = vmatmul.msk.bf16.gmra.mxu3 %vm1049_vm4, %v1555_v7 }
  0xba   : > { %v1173_v19 = vpop.f32.mrf.mxu1 }
  0xbc   : > { %v3755_v44 = vpop.f32.mrf.mxu2  ;;  %2704 = vmatmul.msk.bf16.gmra.mxu2 %vm1049_vm4, %v2925_v8  ;;  %v1817_v8 = vsel %vm1801_vm9, 65537, %v2991_v9  ;;  %vm2219_vm9 = vmand %vm2171_vm8, %vm3816_vm5 }
  0xbd   : > { %v1833_v21 = vunpack.c.l.b16 %v1817_v8 }
  0xbe   : > { %v1088_v40 = vpop.f32.mrf.mxu0 }
  0xbf   : > { %v3758_v51 = vadd.f32 %v1173_v19, %v1088_v40  ;;  %v3768_v11 = vpop.f32.mrf.mxu3  ;;  %v2757_v18 = vunpack.i.l.s16 %v1833_v21 }
  0xc1   : > { %vm1896_vm14 = vcmp.ne.s32.totalorder %v2757_v18, %v3121_v20 }
  0xc2   : > { %v1175_v56 = vpop.f32.mrf.mxu1  ;;  %vm1897_vm15 = vmpackc.low %vm1896_vm14, %vm1895_vm11  ;;  %vm2174_vm11 = vcmp.eq.s32.totalorder %v3333_v52, 7 }
  0xc3   : > { %v1905_v58 = vsel %vm1897_vm15, %v1688_v36, 0  ;;  %vm2222_vm14 = vmand %vm2174_vm11, %vm3816_vm5  ;;  %vm2416_vm15 = vcmask 1042434  }
  0xc4   : > { %2776 = vmatmul.msk.bf16.gmra.mxu0 %vm1049_vm4, %v1904_v62  ;;  %v3771_v57 = vpop.f32.mrf.mxu2 }
  0xc6   : > { %v1090_v49 = vpop.f32.mrf.mxu0 }
  0xc7   : > { %v3773_v54 = vadd.f32 %v1175_v56, %v1090_v49 }
  0xc9   : > { %2741 = vmatmul.msk.bf16.gmra.mxu3 %vm1049_vm4, %v1556_v42 }
  0xcc   : > { %v3776_v9 = vpop.f32.mrf.mxu3  ;;  %2705 = vmatmul.msk.bf16.gmra.mxu2 %vm1049_vm4, %v2926_v27  ;;  %v3800_v27 = vld [vmem:[%s4075_s2] ss:$0 sm:$0xff] }
  0xce   : > { %v1178_v50 = vpop.f32.mrf.mxu1 }
  0xcf   : > { %v3782_v59 = vpop.f32.mrf.mxu2 }
  0xd1   : > { %v1093_v0 = vpop.f32.mrf.mxu0 }
  0xd2   : > { %v3784_v35 = vadd.f32 %v1178_v50, %v1093_v0 }
  0xd4   : > { %v3786_v25 = vpop.f32.mrf.mxu3  ;;  %2777 = vmatmul.msk.bf16.gmra.mxu0 %vm1049_vm4, %v1905_v58  ;;  %vm2034_vm4 = vcmp.lt.s32.totalorder %v3803_v14, 16 }
  0xd6   : > { %v1180_v30 = vpop.f32.mrf.mxu1 }
  0xd7   : > { %v3789_v10 = vpop.f32.mrf.mxu2 }
  0xd9   : > { %v1095_v20 = vpop.f32.mrf.mxu0 }
  0xda   : > { %v3791_v7 = vadd.f32 %v1180_v30, %v1095_v20 }
  0xdc   : > { %v1607_v26 = vpop.f32.mrf.mxu3 }
  0xde   : > { %v1183_v48 = vpop.f32.mrf.mxu1 }
  0xdf   : > { %v3794_v17 = vadd.f32 %v1183_v48, %v3716_v43  ;;  %v1250_v29 = vpop.f32.mrf.mxu2 }
  0xe0   : > { %v1290_v37 = vadd.f32 %v1250_v29, %v3714_v5 }
  0xe1   : > { %v1956_v45 = vpop.f32.mrf.mxu0 }
  0xe2   : > { %v1647_v19 = vadd.f32 %v1607_v26, %v1290_v37 }
  0xe4   : > { %v1609_v47 = vpop.f32.mrf.mxu3  ;;  %v1996_v24 = vadd.f32 %v1956_v45, %v1647_v19 }
  0xe6   : > { %v1185_v40 = vpop.f32.mrf.mxu1  ;;  %v2016_v41 = vadd.f32 %v3800_v27, %v1996_v24 }
  0xe7   : > { %v3807_v43 = vadd.f32 %v1185_v40, %v3741_v12  ;;  %v1252_v5 = vpop.f32.mrf.mxu2 }
  0xe8   : > { %v2038_v63 = vmul.f32 0.5, %v2016_v41  ;;  %v1291_v55 = vadd.f32 %v1252_v5, %v3735_v38  ;;  %v2120_v38 = vmax.f32 %v2016_v41, 0.0 }
  0xe9   : > { %v1958_v8 = vpop.f32.mrf.mxu0 }
  0xea   : > { %v2056_v62 = vsel %vm2034_vm4, %v2038_v63, %v2016_v41  ;;  %v1648_v2 = vadd.f32 %v1609_v47, %v1291_v55 }
  0xeb   : > { %2890 = vtanh.f32 %v2056_v62 }
  0xec   : > { %v1612_v39 = vpop.f32.mrf.mxu3  ;;  %v1997_v56 = vadd.f32 %v1958_v8, %v1648_v2  ;;  %v2840_v2 = vld [vmem:[%s4076_s3 + $0x38] sm:$0xff] }
  0xed   : > { %2485 = vmatpush.bf16.msrb.mxu1 %v2840_v2 }
  0xee   : > { %v2017_v12 = vadd.f32 %v3800_v27, %v1997_v56 }
  0xef   : > { %v1255_v21 = vpop.f32.mrf.mxu2 }
  0xf0   : > { %v2039_v49 = vmul.f32 0.5, %v2017_v12  ;;  %v1292_v42 = vadd.f32 %v1255_v21, %v3758_v51  ;;  %v2121_v45 = vmax.f32 %v2017_v12, 0.0 }
  0xf1   : > { %v2891_v61 = vpop.eup %2890  ;;  %v1961_v18 = vpop.f32.mrf.mxu0 }
  0xf2   : > { %v2088_v50 = vmul.f32 0.5, %v2891_v61  ;;  %v2138_v36 = vsel %vm3816_vm5, %v2891_v61, %v2120_v38  ;;  %v2057_v0 = vsel %vm2034_vm4, %v2039_v49, %v2017_v12  ;;  %v1649_v58 = vadd.f32 %v1612_v39, %v1292_v42 }
  0xf3   : > { %2892 = vtanh.f32 %v2057_v0 }
  0xf4   : > { %v1614_v30 = vpop.f32.mrf.mxu3  ;;  %v2104_v20 = vadd.f32 0.5, %v2088_v50  ;;  %v1998_v26 = vadd.f32 %v1961_v18, %v1649_v58 }
  0xf6   : > { %v2154_v51 = vsel %vm2034_vm4, %v2104_v20, %v2138_v36  ;;  %v2018_v13 = vadd.f32 %v3800_v27, %v1998_v26 }
  0xf7   : > { %v2234_v48 = vsel %vm2218_vm7, -inf, %v2154_v51  ;;  %v1257_v29 = vpop.f32.mrf.mxu2  ;;  %vm2176_vm7 = vcmp.eq.s32.totalorder %v3109_v15, 7 }
  0xf8   : > { %v2250_v37 = vrot.slane %v2234_v48, 4  ;;  %v2040_v19 = vmul.f32 0.5, %v2018_v13  ;;  %v1293_v47 = vadd.f32 %v1257_v29, %v3773_v54  ;;  %v2122_v61 = vmax.f32 %v2018_v13, 0.0  ;;  %vm2224_vm8 = vmand %vm2176_vm7, %vm3816_vm5 }
  0xf9   : > { %v2893_v24 = vpop.eup %2892  ;;  %v1963_v40 = vpop.f32.mrf.mxu0  ;;  %vm2426_vm7 = vcmask 1047559  }
  0xfa   : > { %v2251_v41 = vmax.f32 %v2234_v48, %v2250_v37  ;;  %v2089_v5 = vmul.f32 0.5, %v2893_v24  ;;  %v2139_v63 = vsel %vm3816_vm5, %v2893_v24, %v2121_v45  ;;  %v2058_v55 = vsel %vm2034_vm4, %v2040_v19, %v2018_v13  ;;  %v2839_v19 = vld [vmem:[%s4076_s3 + $0x30] sm:$0xff] }
  0xfb   : > { %2894 = vtanh.f32 %v2058_v55  ;;  %v1650_v8 = vadd.f32 %v1614_v30, %v1293_v47  ;;  %2486 = vmatpush.bf16.msrb.mxu1 %v2839_v19 }
  0xfc   : > { %v1617_v62 = vpop.f32.mrf.mxu3  ;;  %v2252_v54 = vrot.slane %v2251_v41, 2  ;;  %v2105_v39 = vadd.f32 0.5, %v2089_v5 }
  0xfd   : > { %v1999_v22 = vadd.f32 %v1963_v40, %v1650_v8 }
  0xfe   : > { %v2155_v56 = vsel %vm2034_vm4, %v2105_v39, %v2139_v63  ;;  %v2253_v12 = vmax.f32 %v2251_v41, %v2252_v54 }
  0xff   : > { %v2235_v21 = vsel %vm2219_vm9, -inf, %v2155_v56  ;;  %v2019_v38 = vadd.f32 %v3800_v27, %v1999_v22  ;;  %v1260_v49 = vpop.f32.mrf.mxu2  ;;  %vm2420_vm9 = vcmask 1044484  }
 0x100   : > { %v2256_v42 = vrot.slane %v2235_v21, 4  ;;  %v1294_v18 = vadd.f32 %v1260_v49, %v3784_v35  ;;  %v2254_v26 = vrot.slane %v2253_v12, 1 }
 0x101   : > { %v2895_v50 = vpop.eup %2894  ;;  %v2041_v36 = vmul.f32 0.5, %v2019_v38  ;;  %v1966_v0 = vpop.f32.mrf.mxu0  ;;  %v2123_v8 = vmax.f32 %v2019_v38, 0.0 }
 0x102   : > { %v2257_v58 = vmax.f32 %v2235_v21, %v2256_v42  ;;  %v2090_v30 = vmul.f32 0.5, %v2895_v50  ;;  %v2140_v20 = vsel %vm3816_vm5, %v2895_v50, %v2122_v61  ;;  %v1651_v48 = vadd.f32 %v1617_v62, %v1294_v18  ;;  %v3865_v50 = vpop.f32.mrf.mxu1 }
 0x103   : > { %v2059_v51 = vsel %vm2034_vm4, %v2041_v36, %v2019_v38  ;;  %v2255_v47 = vmax.f32 %v2253_v12, %v2254_v26 }
 0x104   : > { %v1619_v29 = vpop.f32.mrf.mxu3  ;;  %v2258_v37 = vrot.slane %v2257_v58, 2  ;;  %v2106_v13 = vadd.f32 0.5, %v2090_v30  ;;  %2896 = vtanh.f32 %v2059_v51  ;;  %v2000_v60 = vadd.f32 %v1966_v0, %v1651_v48 }
 0x105   : > { %v2346_v61 = vpack.c.bf16 %v2255_v47, %v2255_v47 }
 0x106   : > { %v2259_v35 = vmax.f32 %v2257_v58, %v2258_v37  ;;  %v2156_v45 = vsel %vm2034_vm4, %v2106_v13, %v2140_v20  ;;  %v2020_v40 = vadd.f32 %v3800_v27, %v2000_v60 }
 0x107   : > { %v2236_v24 = vsel %vm2220_vm10, -inf, %v2156_v45  ;;  %v1262_v41 = vpop.f32.mrf.mxu2  ;;  %v2398_v26 = vunpack.c.l.b16 %v2346_v61  ;;  %vm2225_vm10 = vmand %vm2177_vm6, %vm3816_vm5 }
 0x108   : > { %v2260_v5 = vrot.slane %v2259_v35, 1  ;;  %v2262_v63 = vrot.slane %v2236_v24, 4  ;;  %v1295_v55 = vadd.f32 %v1262_v41, %v3791_v7  ;;  %v2042_v62 = vmul.f32 0.5, %v2020_v40 }
 0x109   : > { %v1968_v2 = vpop.f32.mrf.mxu0  ;;  %v2124_v13 = vmax.f32 %v2020_v40, 0.0 }
 0x10a   : > { %v2897_v54 = vpop.eup %2896  ;;  %v2261_v39 = vmax.f32 %v2259_v35, %v2260_v5  ;;  %v2263_v22 = vmax.f32 %v2236_v24, %v2262_v63  ;;  %v1652_v56 = vadd.f32 %v1619_v29, %v1295_v55  ;;  %v2060_v49 = vsel %vm2034_vm4, %v2042_v62, %v2020_v40 }
 0x10b   : > { %v2091_v21 = vmul.f32 0.5, %v2897_v54  ;;  %v2141_v12 = vsel %vm3816_vm5, %v2897_v54, %v2123_v8  ;;  %2898 = vtanh.f32 %v2060_v49  ;;  %v1190_v54 = vpop.f32.mrf.mxu1 }
 0x10c   : > { %v1622_v42 = vpop.f32.mrf.mxu3  ;;  %v2264_v7 = vrot.slane %v2263_v22, 2  ;;  %v2001_v38 = vadd.f32 %v1968_v2, %v1652_v56  ;;  %v2347_v18 = vpack.c.bf16 %v2261_v39, %v2261_v39 }
 0x10d   : > { %v2107_v36 = vadd.f32 0.5, %v2091_v21 }
 0x10e   : > { %v2265_v3 = vmax.f32 %v2263_v22, %v2264_v7  ;;  %v2021_v0 = vadd.f32 %v3800_v27, %v2001_v38  ;;  %v2399_v58 = vunpack.c.l.b16 %v2347_v18 }
 0x10f   : > { %v2157_v30 = vsel %vm2034_vm4, %v2107_v36, %v2141_v12  ;;  %v1265_v20 = vpop.f32.mrf.mxu2 }
 0x110   : > { %v2237_v51 = vsel %vm2221_vm0, -inf, %v2157_v30  ;;  %v2043_v48 = vmul.f32 0.5, %v2021_v0  ;;  %v1296_v29 = vadd.f32 %v1265_v20, %v3794_v17  ;;  %v2266_v35 = vrot.slane %v2265_v3, 1 }
 0x111   : > { %v2268_v37 = vrot.slane %v2237_v51, 4  ;;  %v1971_v60 = vpop.f32.mrf.mxu0  ;;  %v2415_v45 = vsel %vm2414_vm13, %v2399_v58, %v2398_v26  ;;  %v2899_v19 = vpop.eup %2898  ;;  %v2125_v12 = vmax.f32 %v2021_v0, 0.0  ;;  %vm2178_vm0 = vcmp.eq.s32.totalorder %v3222_v34, 7 }
 0x112   : > { %v2061_v47 = vsel %vm2034_vm4, %v2043_v48, %v2021_v0  ;;  %v1653_v24 = vadd.f32 %v1622_v42, %v1296_v29  ;;  %v2092_v5 = vmul.f32 0.5, %v2899_v19  ;;  %v2142_v63 = vsel %vm3816_vm5, %v2899_v19, %v2124_v13  ;;  %vm2226_vm11 = vmand %vm2178_vm0, %vm3816_vm5 }
 0x113   : > { %v2269_v41 = vmax.f32 %v2237_v51, %v2268_v37  ;;  %2900 = vtanh.f32 %v2061_v47  ;;  %v2267_v40 = vmax.f32 %v2265_v3, %v2266_v35  ;;  %v1189_v13 = vadd.f32 %v3865_v50, %v3755_v44 }
 0x114   : > { %v1624_v17 = vpop.f32.mrf.mxu3  ;;  %v2002_v55 = vadd.f32 %v1971_v60, %v1653_v24  ;;  %v2108_v62 = vadd.f32 0.5, %v2092_v5 }
 0x115   : > { %v2270_v8 = vrot.slane %v2269_v41, 2  ;;  %v2348_v2 = vpack.c.bf16 %v2267_v40, %v2267_v40  ;;  %v1193_v40 = vpop.f32.mrf.mxu1 }
 0x116   : > { %v2022_v52 = vadd.f32 %v3800_v27, %v2002_v55  ;;  %v2158_v39 = vsel %vm2034_vm4, %v2108_v62, %v2142_v63 }
 0x117   : > { %v1267_v22 = vpop.f32.mrf.mxu2  ;;  %v2271_v56 = vmax.f32 %v2269_v41, %v2270_v8  ;;  %v2238_v21 = vsel %vm2222_vm14, -inf, %v2158_v39  ;;  %v2400_v36 = vunpack.c.l.b16 %v2348_v2  ;;  %vm2424_vm14 = vcmask 1046534  }
 0x118   : > { %v2044_v49 = vmul.f32 0.5, %v2022_v52  ;;  %v1297_v42 = vadd.f32 %v1267_v22, %v3807_v43  ;;  %v2274_v7 = vrot.slane %v2238_v21, 4  ;;  %v2126_v5 = vmax.f32 %v2022_v52, 0.0 }
 0x119   : > { %v2901_v61 = vpop.eup %2900  ;;  %v1973_v38 = vpop.f32.mrf.mxu0  ;;  %v2272_v18 = vrot.slane %v2271_v56, 1  ;;  %v2417_v43 = vsel %vm2416_vm15, %v2400_v36, %v2415_v45 }
 0x11a   : > { %v2093_v3 = vmul.f32 0.5, %v2901_v61  ;;  %v2143_v58 = vsel %vm3816_vm5, %v2901_v61, %v2125_v12  ;;  %v2062_v30 = vsel %vm2034_vm4, %v2044_v49, %v2022_v52  ;;  %v1654_v20 = vadd.f32 %v1624_v17, %v1297_v42  ;;  %v2838_v52 = vld [vmem:[%s4076_s3 + $0x28] sm:$0xff] }
 0x11b   : > { %v2275_v26 = vmax.f32 %v2238_v21, %v2274_v7  ;;  %2902 = vtanh.f32 %v2062_v30  ;;  %v2273_v51 = vmax.f32 %v2271_v56, %v2272_v18  ;;  %2487 = vmatpush.bf16.msrb.mxu1 %v2838_v52 }
 0x11c   : > { %v1627_v0 = vpop.f32.mrf.mxu3  ;;  %v2109_v48 = vadd.f32 0.5, %v2093_v3  ;;  %v2003_v53 = vadd.f32 %v1973_v38, %v1654_v20  ;;  %v1191_v38 = vadd.f32 %v1190_v54, %v3771_v57 }
 0x11d   : > { %v2276_v29 = vrot.slane %v2275_v26, 2  ;;  %v2349_v37 = vpack.c.bf16 %v2273_v51, %v2273_v51 }
 0x11e   : > { %v2159_v60 = vsel %vm2034_vm4, %v2109_v48, %v2143_v58  ;;  %v2023_v35 = vadd.f32 %v3800_v27, %v2003_v53 }
 0x11f   : > { %v2239_v19 = vsel %vm2223_vm3, -inf, %v2159_v60  ;;  %v1270_v47 = vpop.f32.mrf.mxu2  ;;  %v2277_v24 = vmax.f32 %v2275_v26, %v2276_v29  ;;  %v2401_v45 = vunpack.c.l.b16 %v2349_v37  ;;  %v1195_v60 = vpop.f32.mrf.mxu1  ;;  %vm2227_vm3 = vmand %vm2179_vm2, %vm3816_vm5  ;;  %vm2183_vm2 = vcmp.eq.s32.totalorder %v3140_v32, 7 }
 0x120   : > { %v2280_v41 = vrot.slane %v2239_v19, 4  ;;  %v2045_v63 = vmul.f32 0.5, %v2023_v35  ;;  %v1298_v17 = vadd.f32 %v1270_v47, %v1189_v13  ;;  %v2127_v26 = vmax.f32 %v2023_v35, 0.0 }
 0x121   : > { %v2903_v55 = vpop.eup %2902  ;;  %v1976_v8 = vpop.f32.mrf.mxu0  ;;  %v2278_v44 = vrot.slane %v2277_v24, 1  ;;  %v2419_v50 = vsel %vm2418_vm1, %v2401_v45, %v2417_v43 }
 0x122   : > { %v2094_v62 = vmul.f32 0.5, %v2903_v55  ;;  %v2144_v2 = vsel %vm3816_vm5, %v2903_v55, %v2126_v5  ;;  %v2063_v39 = vsel %vm2034_vm4, %v2045_v63, %v2023_v35  ;;  %v1655_v22 = vadd.f32 %v1627_v0, %v1298_v17  ;;  %v2837_v17 = vld [vmem:[%s4076_s3 + $0x20] sm:$0xff] }
 0x123   : > { %2904 = vtanh.f32 %v2063_v39  ;;  %v2279_v21 = vmax.f32 %v2277_v24, %v2278_v44  ;;  %v2281_v12 = vmax.f32 %v2239_v19, %v2280_v41  ;;  %v1194_v5 = vadd.f32 %v1193_v40, %v3782_v59  ;;  %2488 = vmatpush.bf16.msrb.mxu1 %v2837_v17 }
 0x124   : > { %v1629_v56 = vpop.f32.mrf.mxu3  ;;  %v2110_v49 = vadd.f32 0.5, %v2094_v62  ;;  %v2004_v42 = vadd.f32 %v1976_v8, %v1655_v22 }
 0x125   : > { %v2282_v61 = vrot.slane %v2281_v12, 2  ;;  %v2350_v7 = vpack.c.bf16 %v2279_v21, %v2279_v21 }
 0x126   : > { %v2160_v18 = vsel %vm2034_vm4, %v2110_v49, %v2144_v2  ;;  %v2024_v36 = vadd.f32 %v3800_v27, %v2004_v42 }
 0x127   : > { %v1272_v3 = vpop.f32.mrf.mxu2  ;;  %v2240_v58 = vsel %vm2224_vm8, -inf, %v2160_v18  ;;  %v2283_v30 = vmax.f32 %v2281_v12, %v2282_v61  ;;  %v2402_v20 = vunpack.c.l.b16 %v2350_v7  ;;  %vm2180_vm8 = vcmp.eq.s32.totalorder %v3321_v1, 7 }
 0x128   : > { %v2046_v0 = vmul.f32 0.5, %v2024_v36  ;;  %v1299_v51 = vadd.f32 %v1272_v3, %v1191_v38  ;;  %v2286_v43 = vrot.slane %v2240_v58, 4  ;;  %v2128_v2 = vmax.f32 %v2024_v36, 0.0  ;;  %v1198_v3 = vpop.f32.mrf.mxu1  ;;  %vm2228_vm6 = vmand %vm2180_vm8, %vm3816_vm5 }
 0x129   : > { %v2905_v15 = vpop.eup %2904  ;;  %v1978_v48 = vpop.f32.mrf.mxu0  ;;  %v2284_v53 = vrot.slane %v2283_v30, 1  ;;  %v2421_v57 = vsel %vm2420_vm9, %v2402_v20, %v2419_v50  ;;  %v1196_v20 = vadd.f32 %v1195_v60, %v3789_v10 }
 0x12a   : > { %v2095_v54 = vmul.f32 0.5, %v2905_v15  ;;  %v2145_v29 = vsel %vm3816_vm5, %v2905_v15, %v2127_v26  ;;  %v2064_v37 = vsel %vm2034_vm4, %v2046_v0, %v2024_v36  ;;  %v1656_v13 = vadd.f32 %v1629_v56, %v1299_v51 }
 0x12b   : > { %2906 = vtanh.f32 %v2064_v37  ;;  %v2285_v19 = vmax.f32 %v2283_v30, %v2284_v53  ;;  %v2287_v47 = vmax.f32 %v2240_v58, %v2286_v43 }
 0x12c   : > { %v1632_v35 = vpop.f32.mrf.mxu3  ;;  %v2111_v24 = vadd.f32 0.5, %v2095_v54  ;;  %v2005_v45 = vadd.f32 %v1978_v48, %v1656_v13 }
 0x12d   : > { %v2288_v16 = vrot.slane %v2287_v47, 2  ;;  %v2351_v41 = vpack.c.bf16 %v2285_v19, %v2285_v19 }
 0x12e   : > { %v2025_v63 = vadd.f32 %v3800_v27, %v2005_v45  ;;  %v2161_v55 = vsel %vm2034_vm4, %v2111_v24, %v2145_v29 }
 0x12f   : > { %v1275_v8 = vpop.f32.mrf.mxu2  ;;  %v2241_v44 = vsel %vm2225_vm10, -inf, %v2161_v55  ;;  %v2289_v50 = vmax.f32 %v2287_v47, %v2288_v16  ;;  %v2403_v62 = vunpack.c.l.b16 %v2351_v41  ;;  %v2836_v41 = vld [vmem:[%s4076_s3 + $0x18] sm:$0xff]  ;;  %vm2181_vm10 = vcmp.eq.s32.totalorder %v3323_v4, 7 }
 0x130   : > { %v2047_v39 = vmul.f32 0.5, %v2025_v63  ;;  %v1300_v22 = vadd.f32 %v1275_v8, %v1194_v5  ;;  %v2292_v52 = vrot.slane %v2241_v44, 4  ;;  %2489 = vmatpush.bf16.msrb.mxu1 %v2836_v41  ;;  %vm2229_vm0 = vmand %vm2181_vm10, %vm3816_vm5 }
 0x131   : > { %v2907_v59 = vpop.eup %2906  ;;  %v1981_v40 = vpop.f32.mrf.mxu0  ;;  %v2290_v56 = vrot.slane %v2289_v50, 1  ;;  %v2423_v21 = vsel %vm2422_vm12, %v2403_v62, %v2421_v57  ;;  %v2129_v57 = vmax.f32 %v2025_v63, 0.0 }
 0x132   : > { %v2096_v12 = vmul.f32 0.5, %v2907_v59  ;;  %v2146_v49 = vsel %vm3816_vm5, %v2907_v59, %v2128_v2  ;;  %v2065_v42 = vsel %vm2034_vm4, %v2047_v39, %v2025_v63  ;;  %v1657_v61 = vadd.f32 %v1632_v35, %v1300_v22  ;;  %v1200_v62 = vpop.f32.mrf.mxu1 }
 0x133   : > { %2908 = vtanh.f32 %v2065_v42  ;;  %v2291_v38 = vmax.f32 %v2289_v50, %v2290_v56  ;;  %v2293_v18 = vmax.f32 %v2241_v44, %v2292_v52  ;;  %v1199_v44 = vadd.f32 %v1198_v3, %v3749_v6 }
 0x134   : > { %v1634_v7 = vpop.f32.mrf.mxu3  ;;  %v2112_v36 = vadd.f32 0.5, %v2096_v12  ;;  %v2006_v34 = vadd.f32 %v1981_v40, %v1657_v61 }
 0x135   : > { %v2294_v58 = vrot.slane %v2293_v18, 2  ;;  %v2352_v30 = vpack.c.bf16 %v2291_v38, %v2291_v38 }
 0x136   : > { %v2162_v26 = vsel %vm2034_vm4, %v2112_v36, %v2146_v49  ;;  %v2026_v0 = vadd.f32 %v3800_v27, %v2006_v34 }
 0x137   : > { %v2242_v51 = vsel %vm2226_vm11, -inf, %v2162_v26  ;;  %v1277_v43 = vpop.f32.mrf.mxu2  ;;  %v2295_v15 = vmax.f32 %v2293_v18, %v2294_v58  ;;  %v2404_v48 = vunpack.c.l.b16 %v2352_v30  ;;  %v1201_v30 = vadd.f32 %v1200_v62, %v3768_v11 }
 0x138   : > { %v2298_v53 = vrot.slane %v2242_v51, 4  ;;  %v2048_v54 = vmul.f32 0.5, %v2026_v0  ;;  %v1301_v29 = vadd.f32 %v1277_v43, %v1196_v20  ;;  %v2130_v56 = vmax.f32 %v2026_v0, 0.0 }
 0x139   : > { %v2909_v37 = vpop.eup %2908  ;;  %v1983_v13 = vpop.f32.mrf.mxu0  ;;  %v2296_v35 = vrot.slane %v2295_v15, 1  ;;  %v2425_v10 = vsel %vm2424_vm14, %v2404_v48, %v2423_v21  ;;  %vm2182_vm11 = vcmp.eq.s32.totalorder %v3135_v28, 7 }
 0x13a   : > { %v2299_v60 = vmax.f32 %v2242_v51, %v2298_v53  ;;  %v2097_v19 = vmul.f32 0.5, %v2909_v37  ;;  %v2147_v47 = vsel %vm3816_vm5, %v2909_v37, %v2129_v57  ;;  %v2066_v24 = vsel %vm2034_vm4, %v2048_v54, %v2026_v0  ;;  %v2835_v0 = vld [vmem:[%s4076_s3 + $0x10] sm:$0xff] }
 0x13b   : > { %2910 = vtanh.f32 %v2066_v24  ;;  %v1658_v45 = vadd.f32 %v1634_v7, %v1301_v29  ;;  %v2297_v5 = vmax.f32 %v2295_v15, %v2296_v35  ;;  %2490 = vmatpush.bf16.msrb.mxu1 %v2835_v0  ;;  %v1203_v29 = vpop.f32.mrf.mxu1 }
 0x13c   : > { %v1637_v16 = vpop.f32.mrf.mxu3  ;;  %v2300_v63 = vrot.slane %v2299_v60, 2  ;;  %v2113_v17 = vadd.f32 0.5, %v2097_v19  ;;  %v1204_v4 = vadd.f32 %v1203_v29, %v3776_v9 }
 0x13d   : > { %v2007_v55 = vadd.f32 %v1983_v13, %v1658_v45  ;;  %v2353_v8 = vpack.c.bf16 %v2297_v5, %v2297_v5 }
 0x13e   : > { %v2163_v50 = vsel %vm2034_vm4, %v2113_v17, %v2147_v47  ;;  %v2301_v2 = vmax.f32 %v2299_v60, %v2300_v63  ;;  %v2834_v63 = vld [vmem:[%s4076_s3 + $0x8] sm:$0xff] }
 0x13f   : > { %v2243_v39 = vsel %vm2227_vm3, -inf, %v2163_v50  ;;  %v2027_v22 = vadd.f32 %v3800_v27, %v2007_v55  ;;  %v1280_v52 = vpop.f32.mrf.mxu2  ;;  %v2405_v59 = vunpack.c.l.b16 %v2353_v8  ;;  %2491 = vmatpush.bf16.msrb.mxu1 %v2834_v63  ;;  %v2833_v50 = vld [vmem:[%s4076_s3] sm:$0xff]  ;;  %vm2231_vm3 = vmand %vm2183_vm2, %vm3816_vm5 }
 0x140   : > { %v2304_v40 = vrot.slane %v2243_v39, 4  ;;  %v1302_v46 = vadd.f32 %v1280_v52, %v1199_v44  ;;  %v2302_v38 = vrot.slane %v2301_v2, 1 }
 0x141   : > { %v2911_v21 = vpop.eup %2910  ;;  %v2049_v12 = vmul.f32 0.5, %v2027_v22  ;;  %v1986_v49 = vpop.f32.mrf.mxu0  ;;  %v3961_v6 = vsel %vm2426_vm7, %v2405_v59, %v2425_v10  ;;  %v2131_v37 = vmax.f32 %v2027_v22, 0.0 }
 0x142   : > { %v2305_v42 = vmax.f32 %v2243_v39, %v2304_v40  ;;  %v2098_v61 = vmul.f32 0.5, %v2911_v21  ;;  %v2148_v7 = vsel %vm3816_vm5, %v2911_v21, %v2130_v56  ;;  %v1659_v36 = vadd.f32 %v1637_v16, %v1302_v46 }
 0x143   : > { %v2067_v18 = vsel %vm2034_vm4, %v2049_v12, %v2027_v22  ;;  %v2303_v51 = vmax.f32 %v2301_v2, %v2302_v38  ;;  %2492 = vmatpush.bf16.msrb.mxu1 %v2833_v50 }
 0x144   : > { %v2306_v34 = vrot.slane %v2305_v42, 2  ;;  %v2114_v3 = vadd.f32 0.5, %v2098_v61  ;;  %2912 = vtanh.f32 %v2067_v18  ;;  %v2008_v1 = vadd.f32 %v1986_v49, %v1659_v36  ;;  %v1639_v58 = vpop.f32.mrf.mxu3 }
 0x145   : > { %v2354_v16 = vpack.c.bf16 %v2303_v51, %v2303_v51 }
 0x146   : > { %v2307_v20 = vmax.f32 %v2305_v42, %v2306_v34  ;;  %v2164_v26 = vsel %vm2034_vm4, %v2114_v3, %v2148_v7  ;;  %v2028_v15 = vadd.f32 %v3800_v27, %v2008_v1  ;;  %v1205_v7 = vpop.f32.mrf.mxu1 }
 0x147   : > { %v2244_v43 = vsel %vm2228_vm6, -inf, %v2164_v26  ;;  %v1282_v48 = vpop.f32.mrf.mxu2  ;;  %v2406_v52 = vunpack.c.l.b16 %v2354_v16 }
 0x148   : > { %v2308_v53 = vrot.slane %v2307_v20, 1  ;;  %v2310_v57 = vrot.slane %v2244_v43, 4  ;;  %v1303_v54 = vadd.f32 %v1282_v48, %v1201_v30  ;;  %v2050_v11 = vmul.f32 0.5, %v2028_v15 }
 0x149   : > { %v1988_v13 = vpop.f32.mrf.mxu0  ;;  %v2132_v36 = vmax.f32 %v2028_v15, 0.0  ;;  %v1206_v30 = vadd.f32 %v1205_v7, %v3786_v25 }
 0x14a   : > { %v2913_v35 = vpop.eup %2912  ;;  %v2309_v10 = vmax.f32 %v2307_v20, %v2308_v53  ;;  %v2311_v60 = vmax.f32 %v2244_v43, %v2310_v57  ;;  %v1660_v19 = vadd.f32 %v1639_v58, %v1303_v54  ;;  %v2068_v45 = vsel %vm2034_vm4, %v2050_v11, %v2028_v15 }
 0x14b   : > { %v2099_v47 = vmul.f32 0.5, %v2913_v35  ;;  %v2149_v24 = vsel %vm3816_vm5, %v2913_v35, %v2131_v37  ;;  %2914 = vtanh.f32 %v2068_v45 }
 0x14c   : > { %v2312_v41 = vrot.slane %v2311_v60, 2  ;;  %v2009_v5 = vadd.f32 %v1988_v13, %v1660_v19  ;;  %v2355_v17 = vpack.c.bf16 %v2309_v10, %v2309_v10  ;;  %v1642_v39 = vpop.f32.mrf.mxu3 }
 0x14d   : > { %v2115_v55 = vadd.f32 0.5, %v2099_v47 }
 0x14e   : > { %v2313_v8 = vmax.f32 %v2311_v60, %v2312_v41  ;;  %v2029_v44 = vadd.f32 %v3800_v27, %v2009_v5  ;;  %v2407_v62 = vunpack.c.l.b16 %v2355_v17 }
 0x14f   : > { %v2165_v2 = vsel %vm2034_vm4, %v2115_v55, %v2149_v24  ;;  %v1285_v22 = vpop.f32.mrf.mxu2 }
 0x150   : > { %v2245_v59 = vsel %vm2229_vm0, -inf, %v2165_v2  ;;  %v2051_v40 = vmul.f32 0.5, %v2029_v44  ;;  %v1304_v56 = vadd.f32 %v1285_v22, %v1204_v4  ;;  %v2314_v21 = vrot.slane %v2313_v8, 1 }
 0x151   : > { %v2316_v46 = vrot.slane %v2245_v59, 4  ;;  %v1991_v9 = vpop.f32.mrf.mxu0  ;;  %v2428_v12 = vsel %vm2414_vm13, %v2407_v62, %v2406_v52  ;;  %v2915_v49 = vpop.eup %2914  ;;  %vm2230_vm13 = vmand %vm2182_vm11, %vm3816_vm5  ;;  %v2133_v13 = vmax.f32 %v2029_v44, 0.0 }
 0x152   : > { %v2069_v42 = vsel %vm2034_vm4, %v2051_v40, %v2029_v44  ;;  %v1661_v61 = vadd.f32 %v1642_v39, %v1304_v56  ;;  %v2100_v18 = vmul.f32 0.5, %v2915_v49  ;;  %v2315_v3 = vmax.f32 %v2313_v8, %v2314_v21 }
 0x153   : > { %v2317_v38 = vmax.f32 %v2245_v59, %v2316_v46  ;;  %2916 = vtanh.f32 %v2069_v42  ;;  %v2150_v28 = vsel %vm3816_vm5, %v2915_v49, %v2132_v36 }
 0x154   : > { %v2010_v34 = vadd.f32 %v1991_v9, %v1661_v61  ;;  %v2116_v58 = vadd.f32 0.5, %v2100_v18  ;;  %v2356_v26 = vpack.c.bf16 %v2315_v3, %v2315_v3  ;;  %v1644_v29 = vpop.f32.mrf.mxu3 }
 0x155   : > { %v2318_v1 = vrot.slane %v2317_v38, 2 }
 0x156   : > { %v2030_v20 = vadd.f32 %v3800_v27, %v2010_v34  ;;  %v2166_v0 = vsel %vm2034_vm4, %v2116_v58, %v2150_v28  ;;  %v2408_v37 = vunpack.c.l.b16 %v2356_v26 }
 0x157   : > { %v1287_v51 = vpop.f32.mrf.mxu2  ;;  %v2319_v43 = vmax.f32 %v2317_v38, %v2318_v1  ;;  %v2246_v15 = vsel %vm2230_vm13, -inf, %v2166_v0 }
 0x158   : > { %v2052_v48 = vmul.f32 0.5, %v2030_v20  ;;  %v1305_v53 = vadd.f32 %v1287_v51, %v1206_v30  ;;  %v2322_v54 = vrot.slane %v2246_v15, 4  ;;  %v2429_v24 = vsel %vm2416_vm15, %v2408_v37, %v2428_v12 }
 0x159   : > { %v2917_v57 = vpop.eup %2916  ;;  %v2320_v25 = vrot.slane %v2319_v43, 1  ;;  %v1993_v19 = vpop.f32.mrf.mxu0  ;;  %vm2184_vm15 = vcmp.eq.s32.totalorder %v3298_v23, 7  ;;  %v2134_v40 = vmax.f32 %v2030_v20, 0.0 }
 0x15a   : > { %v2101_v11 = vmul.f32 0.5, %v2917_v57  ;;  %v2070_v35 = vsel %vm2034_vm4, %v2052_v48, %v2030_v20  ;;  %v1662_v10 = vadd.f32 %v1644_v29, %v1305_v53  ;;  %v2323_v60 = vmax.f32 %v2246_v15, %v2322_v54  ;;  %vm2232_vm8 = vmand %vm2184_vm15, %vm3816_vm5 }
 0x15b   : > { %2918 = vtanh.f32 %v2070_v35  ;;  %v2321_v47 = vmax.f32 %v2319_v43, %v2320_v25  ;;  %v2151_v16 = vsel %vm3816_vm5, %v2917_v57, %v2133_v13 }
 0x15c   : > { %v2117_v45 = vadd.f32 0.5, %v2101_v11  ;;  %v2011_v32 = vadd.f32 %v1993_v19, %v1662_v10  ;;  %v2324_v41 = vrot.slane %v2323_v60, 2  ;;  %v2889_v19 = vld [vmem:[%s4077_s4] ss:$0 sm:$0xff] }
 0x15d   : > { %v2357_v5 = vpack.c.bf16 %v2321_v47, %v2321_v47 }
 0x15e   : > { %v2167_v63 = vsel %vm2034_vm4, %v2117_v45, %v2151_v16  ;;  %v2031_v17 = vadd.f32 %v3800_v27, %v2011_v32  ;;  %v2325_v4 = vmax.f32 %v2323_v60, %v2324_v41 }
 0x15f   : > { %v2247_v55 = vsel %vm2231_vm3, -inf, %v2167_v63  ;;  %v2409_v8 = vunpack.c.l.b16 %v2357_v5 }
 0x160   : > { %v2328_v44 = vrot.slane %v2247_v55, 4  ;;  %v2053_v50 = vmul.f32 0.5, %v2031_v17  ;;  %v2326_v2 = vrot.slane %v2325_v4, 1  ;;  %v2135_v1 = vmax.f32 %v2031_v17, 0.0 }
 0x161   : > { %v2919_v62 = vpop.eup %2918  ;;  %v2430_v39 = vsel %vm2418_vm1, %v2409_v8, %v2429_v24  ;;  %vm2185_vm1 = vcmp.eq.s32.totalorder %v3302_v33, 7 }
 0x162   : > { %v2102_v22 = vmul.f32 0.5, %v2919_v62  ;;  %v2071_v52 = vsel %vm2034_vm4, %v2053_v50, %v2031_v17  ;;  %v2329_v59 = vmax.f32 %v2247_v55, %v2328_v44  ;;  %v2327_v56 = vmax.f32 %v2325_v4, %v2326_v2  ;;  %vm2233_vm6 = vmand %vm2185_vm1, %vm3816_vm5 }
 0x163   : > { %2920 = vtanh.f32 %v2071_v52  ;;  %v2152_v9 = vsel %vm3816_vm5, %v2919_v62, %v2134_v40 }
 0x164   : > { %v2118_v27 = vadd.f32 0.5, %v2102_v22  ;;  %v2330_v46 = vrot.slane %v2329_v59, 2  ;;  %v2358_v23 = vpack.c.bf16 %v2327_v56, %v2327_v56 }
 0x166   : > { %v2168_v21 = vsel %vm2034_vm4, %v2118_v27, %v2152_v9  ;;  %v2331_v12 = vmax.f32 %v2329_v59, %v2330_v46  ;;  %v2410_v42 = vunpack.c.l.b16 %v2358_v23 }
 0x167   : > { %v2248_v49 = vsel %vm2232_vm8, -inf, %v2168_v21 }
 0x168   : > { %v2332_v61 = vrot.slane %v2331_v12, 1  ;;  %v2334_v7 = vrot.slane %v2248_v49, 4  ;;  %v2431_v18 = vsel %vm2420_vm9, %v2410_v42, %v2430_v39 }
 0x169   : > { %v2921_v38 = vpop.eup %2920 }
 0x16a   : > { %v2103_v36 = vmul.f32 0.5, %v2921_v38  ;;  %v2333_v34 = vmax.f32 %v2331_v12, %v2332_v61  ;;  %v2335_v3 = vmax.f32 %v2248_v49, %v2334_v7  ;;  %v2153_v20 = vsel %vm3816_vm5, %v2921_v38, %v2135_v1 }
 0x16c   : > { %v2119_v58 = vadd.f32 0.5, %v2103_v36  ;;  %v2336_v30 = vrot.slane %v2335_v3, 2  ;;  %v2359_v28 = vpack.c.bf16 %v2333_v34, %v2333_v34 }
 0x16e   : > { %v2169_v26 = vsel %vm2034_vm4, %v2119_v58, %v2153_v20  ;;  %v2337_v0 = vmax.f32 %v2335_v3, %v2336_v30  ;;  %v2411_v33 = vunpack.c.l.b16 %v2359_v28 }
 0x16f   : > { %v2249_v51 = vsel %vm2233_vm6, -inf, %v2169_v26 }
 0x170   : > { %v2338_v43 = vrot.slane %v2337_v0, 1  ;;  %v2340_v15 = vrot.slane %v2249_v51, 4  ;;  %v2432_v48 = vsel %vm2422_vm12, %v2411_v33, %v2431_v18 }
 0x172   : > { %v2339_v53 = vmax.f32 %v2337_v0, %v2338_v43  ;;  %v2341_v57 = vmax.f32 %v2249_v51, %v2340_v15 }
 0x174   : > { %v2342_v54 = vrot.slane %v2341_v57, 2  ;;  %v2360_v29 = vpack.c.bf16 %v2339_v53, %v2339_v53 }
 0x176   : > { %v2343_v25 = vmax.f32 %v2341_v57, %v2342_v54  ;;  %v2412_v37 = vunpack.c.l.b16 %v2360_v29 }
 0x178   : > { %v2344_v31 = vrot.slane %v2343_v25, 1  ;;  %v2433_v11 = vsel %vm2424_vm14, %v2412_v37, %v2432_v48 }
 0x17a   : > { %v2345_v14 = vmax.f32 %v2343_v25, %v2344_v31 }
 0x17c   : > { %v2361_v13 = vpack.c.bf16 %v2345_v14, %v2345_v14 }
 0x17e   : > { %v2413_v35 = vunpack.c.l.b16 %v2361_v13 }
 0x180   : > { %v2434_v10 = vsel %vm2426_vm7, %v2413_v35, %v2433_v11 }
 0x181   : > { %v2435_v60 = vpack.c.b16 %v2434_v10, %v3961_v6 }
 0x183   : > { %2493 = vmatmul.bf16.vlgmr.msrb.gmra.mxu1 %v2435_v60 }
 0x200   : > { %v2494_v47 = vpop.f32.mrf.mxu1 }
 0x201   : > { %v2495_v24 = vadd.f32 %v2889_v19, %v2494_v47 }
 0x203   : > { %2499 = vst [vmem:[%s218_s26] sm:$0xff] %v2495_v24 }
 0x208   : > { %v2496_v6 = vpop.f32.mrf.mxu1 }
 0x209   : > { %v2497_v45 = vadd.f32 %v2889_v19, %v2496_v6 }
 0x20b   : > { %2500 = vst [vmem:[%s218_s26 + $0x8] sm:$0xff] %v2497_v45 }
 0x20c   : > { %2954 = shalt.err (!%p2951_p3)
}
 0x20d   : > { %s2992_s17 = smov 128   ;;  %s2993_s23 = smov 8  }
 0x20e   : > { %2846 = dma.vmem_to_hbm [thread:$0]  (%p3059_p5), %s2515_s8, 256, %s2517_s10, %s2502_s11, %s2992_s17, %s2992_s17, %s2993_s23  }
 0x20f PF: > { %p2852_p4 = scmp.ge.s32.totalorder %s2989_s21, 2  ;;  %s2531_s25 = sand.u32 1, %s2977_s18  }
 0x210   : > { %s2532_s26 = scalar_lea.sflag [#allocation3], %s2531_s25 }
 0x211   : > { %p2849_p7 = pnand %p2852_p4, %p3063_p6 }
 0x213   : > { %p2850_p8 = pneg %p2849_p7 }
 0x215   : > { %2972 = dma.done.wait (%p2850_p8), %s2532_s26, 256  }
 0x216   : > { %2974 = vsyncadd (%p2850_p8), %s2532_s26, 4294967040  ;;  %p15_p9 = scmp.ge.s32.totalorder %s3047_s24, 4   ;;  %s4117_s18 = smov %s2981_s19 }
 0x217   : > { %s4118_s19 = smov %s2985_s20  ;;  %s4119_s20 = smov %s3057_s27 }
 0x218   : > { %s4120_s21 = smov %s3047_s24  ;;  %17 = sbr.rel (!%p15_p9) target bundleno = 3 (0x3), region = 79 }
 0x21d   :  { %2538 = vsyncpa [#allocation3], 1 }
 0x21e   :  { %2540 = vsyncpa [#allocation3 + $0x1], 1 }

</bundles_post_ra>
